<compile_context>
chip_gen: v6e
topology: v6e:2x2x1
jax: 0.10.0
libtpu: 0.0.40
codegen_flags: <defaults>
</compile_context>

<pallas_src>
import functools

import jax
import jax.numpy as jnp
from jax.experimental import pallas as pl
from jax.experimental.pallas import tpu as pltpu

NEG_SLOPE = 0.01      # nn.LeakyReLU default
BN_EPS = 1e-5         # nn.BatchNorm1d default
NORM_EPS = 1e-12      # F.normalize default

H1, H2 = 512, 256     # hidden widths of self.f


def _leaky_relu(x):
    return jnp.where(x >= 0, x, NEG_SLOPE * x)


def _bn_scale_shift(s, ss, gamma, beta, n):
    """Training-mode BN (batch stats, biased var) folded to y = h*scale + shift."""
    inv_n = 1.0 / n
    mean = s * inv_n
    var = jnp.maximum(ss * inv_n - mean * mean, 0.0)   # one-pass stats, clamp fp noise
    scale = gamma * jax.lax.rsqrt(var + BN_EPS)
    shift = beta - mean * scale
    return scale, shift


def _l2_normalize(x):
    # F.normalize(x, dim=-1) == x / max(||x||, eps); rsqrt keeps this on the EUP.
    sumsq = jnp.sum(x * x, axis=-1, keepdims=True)
    return x * jax.lax.rsqrt(jnp.maximum(sumsq, NORM_EPS * NORM_EPS))


def base_mlp_kernel(x_ref,
                    w1_ref, b1_ref, g1_ref, be1_ref,
                    w2_ref, b2_ref, g2_ref, be2_ref,
                    w3_ref, b3_ref,
                    w4_ref, b4_ref,
                    emb_ref, proj_ref,
                    h1_ref, h2_ref, s1_ref, ss1_ref, s2_ref, ss2_ref,
                    *, batch_size, block_b):
    phase = pl.program_id(0)
    tile = pl.program_id(1)
    row0 = pl.multiple_of(tile * block_b, block_b)

    def mm(a, w_ref):
        # bf16 MXU operands, f32 accumulation.
        return jnp.dot(a.astype(jnp.bfloat16), w_ref[...],
                       preferred_element_type=jnp.float32)

    # ---- phase 0: h1 = x @ W1 + b1 ; accumulate BN1 batch statistics --------
    @pl.when(phase == 0)
    def _():
        @pl.when(tile == 0)
        def _():
            s1_ref[...] = jnp.zeros_like(s1_ref)
            ss1_ref[...] = jnp.zeros_like(ss1_ref)
            s2_ref[...] = jnp.zeros_like(s2_ref)
            ss2_ref[...] = jnp.zeros_like(ss2_ref)

        h1 = mm(x_ref[...], w1_ref) + b1_ref[...]
        h1_ref[pl.ds(row0, block_b), :] = h1.astype(h1_ref.dtype)
        s1_ref[...] += jnp.sum(h1, axis=0, keepdims=True)
        ss1_ref[...] += jnp.sum(h1 * h1, axis=0, keepdims=True)

    # ---- phase 1: BN1 + LeakyReLU -> h2 = . @ W2 + b2 ; BN2 statistics ------
    @pl.when(phase == 1)
    def _():
        # Fold BN1 once (tile 0); stash scale/shift in the consumed stat buffers.
        @pl.when(tile == 0)
        def _():
            sc, sh = _bn_scale_shift(s1_ref[...], ss1_ref[...],
                                     g1_ref[...], be1_ref[...], batch_size)
            s1_ref[...] = sc
            ss1_ref[...] = sh

        scale1 = s1_ref[...]
        shift1 = ss1_ref[...]
        h1 = h1_ref[pl.ds(row0, block_b), :].astype(jnp.float32)
        a1 = _leaky_relu(h1 * scale1 + shift1)
        h2 = mm(a1, w2_ref) + b2_ref[...]
        h2_ref[pl.ds(row0, block_b), :] = h2.astype(h2_ref.dtype)
        s2_ref[...] += jnp.sum(h2, axis=0, keepdims=True)
        ss2_ref[...] += jnp.sum(h2 * h2, axis=0, keepdims=True)

    # ---- phase 2: BN2 + LeakyReLU -> emb, proj, L2 normalize ----------------
    # (emb/proj output BlockSpecs only advance in this phase, so no dead
    #  writebacks happen during phases 0/1.)
    @pl.when(phase == 2)
    def _():
        @pl.when(tile == 0)
        def _():
            sc, sh = _bn_scale_shift(s2_ref[...], ss2_ref[...],
                                     g2_ref[...], be2_ref[...], batch_size)
            s2_ref[...] = sc
            ss2_ref[...] = sh

        scale2 = s2_ref[...]
        shift2 = ss2_ref[...]
        h2 = h2_ref[pl.ds(row0, block_b), :].astype(jnp.float32)
        a2 = _leaky_relu(h2 * scale2 + shift2)
        emb = mm(a2, w3_ref) + b3_ref[...]
        proj = mm(_leaky_relu(emb), w4_ref) + b4_ref[...]
        emb_ref[...] = _l2_normalize(emb)
        proj_ref[...] = _l2_normalize(proj)


def _pick_block_b(batch, max_block=1024):
    """Largest batch tile dividing B; prefer multiples of 128 (MXU M-dim),
    then multiples of 8, else the full batch."""
    if batch <= max_block:
        return batch
    for tb in range(max_block - max_block % 128, 127, -128):
        if batch % tb == 0:
            return tb
    for tb in range(max_block - max_block % 8, 7, -8):
        if batch % tb == 0:
            return tb
    return batch


def _vmem_limit(est_bytes):
    """Generation-aware VMEM limit: ~85% of physical capacity, floor 32 MiB."""
    cap = 64 << 20            # conservative fallback (v7x per-TC VMEM)
    try:
        cap = int(0.85 * pltpu.get_tpu_info().vmem_capacity_bytes)
    except Exception:
        pass
    return min(max(est_bytes, 32 << 20), cap)


def base_mlp_forward(x, params, block_b=None):
    batch, in_dim = x.shape
    feature_dim = params["w4"].shape[1]
    if block_b is None:
        block_b = _pick_block_b(batch)
    assert batch % block_b == 0, "batch must be divisible by the batch tile"
    n_tiles = batch // block_b

    args = (x,
            params["w1"], params["b1"], params["g1"], params["be1"],
            params["w2"], params["b2"], params["g2"], params["be2"],
            params["w3"], params["b3"],
            params["w4"], params["b4"])

    resident = lambda p, t: (0, 0)                              # loaded once, VMEM-resident
    # x only advances per tile during phase 0; afterwards stay at the last
    # block so no redundant input DMA is issued in phases 1/2.
    x_map = lambda p, t: (jnp.where(p == 0, t, n_tiles - 1), 0)
    # emb/proj only advance per tile during phase 2; constant block index in
    # phases 0/1 means no writeback of dead data to HBM.
    out_map = lambda p, t: (jnp.where(p == 2, t, 0), 0)

    in_specs = [pl.BlockSpec((block_b, in_dim), x_map)]
    for a in args[1:]:
        in_specs.append(pl.BlockSpec(a.shape, resident))

    out_specs = (pl.BlockSpec((block_b, feature_dim), out_map),
                 pl.BlockSpec((block_b, feature_dim), out_map))

    # h1/h2 full-batch scratch in bf16 (halves the VMEM limiter); fall back to
    # f32 if the tile is not a multiple of the bf16 sublane packing (16).
    h_dtype = jnp.bfloat16 if block_b % 16 == 0 else jnp.float32
    h_itemsize = jnp.dtype(h_dtype).itemsize
    scratch_shapes = [
        pltpu.VMEM((batch, H1), h_dtype),       # h1 (pre-BN) for the whole batch
        pltpu.VMEM((batch, H2), h_dtype),       # h2 (pre-BN) for the whole batch
        pltpu.VMEM((1, H1), jnp.float32),       # sum(h1)   -> later BN1 scale
        pltpu.VMEM((1, H1), jnp.float32),       # sum(h1^2) -> later BN1 shift
        pltpu.VMEM((1, H2), jnp.float32),       # sum(h2)   -> later BN2 scale
        pltpu.VMEM((1, H2), jnp.float32),       # sum(h2^2) -> later BN2 shift
    ]

    # VMEM budget: resident weights + full-batch scratch + double-buffered tiles.
    param_bytes = sum(int(a.size) * a.dtype.itemsize for a in args[1:])
    scratch_bytes = h_itemsize * batch * (H1 + H2) + 4 * 2 * (H1 + H2)
    tile_bytes = 2 * 4 * (block_b * in_dim + 2 * block_b * feature_dim)
    est = int(1.5 * (param_bytes + scratch_bytes + tile_bytes)) + (8 << 20)
    vmem_limit = _vmem_limit(est)

    kernel = functools.partial(base_mlp_kernel,
                               batch_size=float(batch), block_b=block_b)

    return pl.pallas_call(
        kernel,
        out_shape=(jax.ShapeDtypeStruct((batch, feature_dim), jnp.float32),
                   jax.ShapeDtypeStruct((batch, feature_dim), jnp.float32)),
        grid_spec=pltpu.PrefetchScalarGridSpec(
            num_scalar_prefetch=0,
            grid=(3, n_tiles),                     # (phase, batch tile)
            in_specs=in_specs,
            out_specs=out_specs,
            scratch_shapes=scratch_shapes),
        compiler_params=pltpu.CompilerParams(
            # Phase axis is sequential by construction; batch axis is
            # "arbitrary" because BN statistics accumulate across tiles.
            dimension_semantics=("arbitrary", "arbitrary"),
            vmem_limit_bytes=vmem_limit),
    )(*args)


def init_params(key, in_dim, feature_dim=128):
    """Mirror initialize_weights(): Linear weight ~ kaiming_normal_(fan_out,
    'leaky_relu') => std = sqrt(2 / out_features), bias = 0; BN gamma=1, beta=0.
    Linear weights are stored transposed to (in, out) and in bf16 (MXU operand
    dtype); biases / BN params stay f32."""
    dims = [(in_dim, H1), (H1, H2), (H2, feature_dim), (feature_dim, feature_dim)]
    keys = jax.random.split(key, len(dims))
    params = {}
    for i, ((din, dout), k) in enumerate(zip(dims, keys), start=1):
        std = (2.0 / dout) ** 0.5
        params[f"w{i}"] = (std * jax.random.normal(k, (din, dout), jnp.float32)
                           ).astype(jnp.bfloat16)
        params[f"b{i}"] = jnp.zeros((1, dout), jnp.float32)
    params["g1"] = jnp.ones((1, H1), jnp.float32)
    params["be1"] = jnp.zeros((1, H1), jnp.float32)
    params["g2"] = jnp.ones((1, H2), jnp.float32)
    params["be2"] = jnp.zeros((1, H2), jnp.float32)
    return params


def _reference(x, params):
    """Pure-JAX reference with the same bf16 matmul-boundary casts (f32 elsewhere)."""
    def mm(a, w):
        return jnp.dot(a.astype(jnp.bfloat16), w, preferred_element_type=jnp.float32)

    def bn(h, g, b):
        mean = jnp.mean(h, axis=0, keepdims=True)
        var = jnp.mean((h - mean) ** 2, axis=0, keepdims=True)
        return (h - mean) * jax.lax.rsqrt(var + BN_EPS) * g + b

    def l2n(v):
        n = jnp.sqrt(jnp.sum(v * v, axis=-1, keepdims=True))
        return v / jnp.maximum(n, NORM_EPS)

    h = _leaky_relu(bn(mm(x, params["w1"]) + params["b1"], params["g1"], params["be1"]))
    h = _leaky_relu(bn(mm(h, params["w2"]) + params["b2"], params["g2"], params["be2"]))
    emb = mm(h, params["w3"]) + params["b3"]
    proj = mm(_leaky_relu(emb), params["w4"]) + params["b4"]
    return l2n(emb), l2n(proj)


if __name__ == "__main__":
    B, IN_DIM, FEATURE_DIM = 64, 64, 128
    key = jax.random.PRNGKey(0)
    kx, kp = jax.random.split(key)
    x = jax.random.normal(kx, (B, IN_DIM), jnp.float32)
    params = init_params(kp, IN_DIM, FEATURE_DIM)

    # block_b=32 -> 2 batch tiles x 3 phases exercises the phase-aware specs
    # and the bf16 h1/h2 scratch path.
    emb, proj = base_mlp_forward(x, params, block_b=32)
    jax.block_until_ready((emb, proj))

    assert emb.shape == (B, FEATURE_DIM) and proj.shape == (B, FEATURE_DIM)
    # rows should be unit-norm after F.normalize
    assert jnp.allclose(jnp.linalg.norm(emb, axis=-1), 1.0, atol=1e-3)
    assert jnp.allclose(jnp.linalg.norm(proj, axis=-1), 1.0, atol=1e-3)

    # match the pure-JAX reference (full-batch BN stats must be exact; bf16
    # storage of h1/h2 adds a small extra rounding term, hence 1e-2).
    ref_emb, ref_proj = _reference(x, params)
    assert jnp.allclose(emb, ref_emb, atol=1e-2), float(jnp.max(jnp.abs(emb - ref_emb)))
    assert jnp.allclose(proj, ref_proj, atol=1e-2), float(jnp.max(jnp.abs(proj - ref_proj)))
    print("KERNEL_OK")
</pallas_src>

<mosaic_0001>
module attributes {stable_mosaic.version = 11 : i64} {
  func.func @base_mlp_kernel(%arg0: i32, %arg1: i32, %arg2: memref<32x64xf32, #tpu.memory_space<vmem>>, %arg3: memref<64x512xbf16, #tpu.memory_space<vmem>>, %arg4: memref<1x512xf32, #tpu.memory_space<vmem>>, %arg5: memref<1x512xf32, #tpu.memory_space<vmem>>, %arg6: memref<1x512xf32, #tpu.memory_space<vmem>>, %arg7: memref<512x256xbf16, #tpu.memory_space<vmem>>, %arg8: memref<1x256xf32, #tpu.memory_space<vmem>>, %arg9: memref<1x256xf32, #tpu.memory_space<vmem>>, %arg10: memref<1x256xf32, #tpu.memory_space<vmem>>, %arg11: memref<256x128xbf16, #tpu.memory_space<vmem>>, %arg12: memref<1x128xf32, #tpu.memory_space<vmem>>, %arg13: memref<128x128xbf16, #tpu.memory_space<vmem>>, %arg14: memref<1x128xf32, #tpu.memory_space<vmem>>, %arg15: memref<32x128xf32, #tpu.memory_space<vmem>>, %arg16: memref<32x128xf32, #tpu.memory_space<vmem>>, %arg17: memref<64x512xbf16, #tpu.memory_space<vmem>>, %arg18: memref<64x256xbf16, #tpu.memory_space<vmem>>, %arg19: memref<1x512xf32, #tpu.memory_space<vmem>>, %arg20: memref<1x512xf32, #tpu.memory_space<vmem>>, %arg21: memref<1x256xf32, #tpu.memory_space<vmem>>, %arg22: memref<1x256xf32, #tpu.memory_space<vmem>>) attributes {dimension_semantics = [#tpu.dimension_semantics<arbitrary>, #tpu.dimension_semantics<arbitrary>], iteration_bounds = array<i64: 3, 2>, scalar_prefetch = 0 : i64, scratch_operands = 6 : i64, tpu.core_type = #tpu.core_type<tc>, window_params = [{transform_indices = @transform_0, window_bounds = array<i64: 32, 64>}, {pipeline_mode = #tpu.pipeline_mode<synchronous>, transform_indices = @transform_1, window_bounds = array<i64: 64, 512>}, {pipeline_mode = #tpu.pipeline_mode<synchronous>, transform_indices = @transform_2, window_bounds = array<i64: 1, 512>}, {pipeline_mode = #tpu.pipeline_mode<synchronous>, transform_indices = @transform_3, window_bounds = array<i64: 1, 512>}, {pipeline_mode = #tpu.pipeline_mode<synchronous>, transform_indices = @transform_4, window_bounds = array<i64: 1, 512>}, {pipeline_mode = #tpu.pipeline_mode<synchronous>, transform_indices = @transform_5, window_bounds = array<i64: 512, 256>}, {pipeline_mode = #tpu.pipeline_mode<synchronous>, transform_indices = @transform_6, window_bounds = array<i64: 1, 256>}, {pipeline_mode = #tpu.pipeline_mode<synchronous>, transform_indices = @transform_7, window_bounds = array<i64: 1, 256>}, {pipeline_mode = #tpu.pipeline_mode<synchronous>, transform_indices = @transform_8, window_bounds = array<i64: 1, 256>}, {pipeline_mode = #tpu.pipeline_mode<synchronous>, transform_indices = @transform_9, window_bounds = array<i64: 256, 128>}, {pipeline_mode = #tpu.pipeline_mode<synchronous>, transform_indices = @transform_10, window_bounds = array<i64: 1, 128>}, {pipeline_mode = #tpu.pipeline_mode<synchronous>, transform_indices = @transform_11, window_bounds = array<i64: 128, 128>}, {pipeline_mode = #tpu.pipeline_mode<synchronous>, transform_indices = @transform_12, window_bounds = array<i64: 1, 128>}, {transform_indices = @transform_13, window_bounds = array<i64: 32, 128>}, {transform_indices = @transform_14, window_bounds = array<i64: 32, 128>}]} {
    %c32_i32 = arith.constant 32 : i32
    %0 = arith.muli %arg1, %c32_i32 : i32
    %1 = tpu.assume_multiple %0, 32 : i32
    %c0_i32 = arith.constant 0 : i32
    %2 = arith.cmpi eq, %arg0, %c0_i32 : i32
    %3 = arith.extui %2 : i1 to i32
    %c0_i32_0 = arith.constant 0 : i32
    %4 = arith.cmpi ne, %3, %c0_i32_0 : i32
    scf.if %4 {
      %c0_i32_3 = arith.constant 0 : i32
      %11 = arith.cmpi eq, %arg1, %c0_i32_3 : i32
      %12 = arith.extui %11 : i1 to i32
      %c0_i32_4 = arith.constant 0 : i32
      %13 = arith.cmpi ne, %12, %c0_i32_4 : i32
      scf.if %13 {
        %cst_21 = arith.constant 0.000000e+00 : f32
        %35 = vector.broadcast %cst_21 : f32 to vector<1x512xf32>
        %c0_22 = arith.constant 0 : index
        %c0_23 = arith.constant 0 : index
        %36 = vector.load %arg19[%c0_22, %c0_23] : memref<1x512xf32, #tpu.memory_space<vmem>>, vector<1x512xf32>
        tpu.vector_store %arg19[%c0_22, %c0_23], %35 {strides = array<i32>} : memref<1x512xf32, #tpu.memory_space<vmem>>, vector<1x512xf32>,
        %cst_24 = arith.constant 0.000000e+00 : f32
        %37 = vector.broadcast %cst_24 : f32 to vector<1x512xf32>
        %c0_25 = arith.constant 0 : index
        %c0_26 = arith.constant 0 : index
        %38 = vector.load %arg20[%c0_25, %c0_26] : memref<1x512xf32, #tpu.memory_space<vmem>>, vector<1x512xf32>
        tpu.vector_store %arg20[%c0_25, %c0_26], %37 {strides = array<i32>} : memref<1x512xf32, #tpu.memory_space<vmem>>, vector<1x512xf32>,
        %cst_27 = arith.constant 0.000000e+00 : f32
        %39 = vector.broadcast %cst_27 : f32 to vector<1x256xf32>
        %c0_28 = arith.constant 0 : index
        %c0_29 = arith.constant 0 : index
        %40 = vector.load %arg21[%c0_28, %c0_29] : memref<1x256xf32, #tpu.memory_space<vmem>>, vector<1x256xf32>
        tpu.vector_store %arg21[%c0_28, %c0_29], %39 {strides = array<i32>} : memref<1x256xf32, #tpu.memory_space<vmem>>, vector<1x256xf32>,
        %cst_30 = arith.constant 0.000000e+00 : f32
        %41 = vector.broadcast %cst_30 : f32 to vector<1x256xf32>
        %c0_31 = arith.constant 0 : index
        %c0_32 = arith.constant 0 : index
        %42 = vector.load %arg22[%c0_31, %c0_32] : memref<1x256xf32, #tpu.memory_space<vmem>>, vector<1x256xf32>
        tpu.vector_store %arg22[%c0_31, %c0_32], %41 {strides = array<i32>} : memref<1x256xf32, #tpu.memory_space<vmem>>, vector<1x256xf32>,
      } else {
      }
      %c0 = arith.constant 0 : index
      %c0_5 = arith.constant 0 : index
      %14 = vector.load %arg2[%c0, %c0_5] : memref<32x64xf32, #tpu.memory_space<vmem>>, vector<32x64xf32>
      %15 = arith.truncf %14 : vector<32x64xf32> to vector<32x64xbf16>
      %c0_6 = arith.constant 0 : index
      %c0_7 = arith.constant 0 : index
      %16 = vector.load %arg3[%c0_6, %c0_7] : memref<64x512xbf16, #tpu.memory_space<vmem>>, vector<64x512xbf16>
      %cst = arith.constant dense<0.000000e+00> : vector<32x512xf32>
      %17 = tpu.matmul %15, %16, %cst {dimension_numbers = #tpu.dot_dimension_numbers<[1], [0], [0], [1], [0, 0, 1, 1], [], []>} : vector<32x64xbf16>, vector<64x512xbf16>, vector<32x512xf32> -> vector<32x512xf32>
      %c0_8 = arith.constant 0 : index
      %c0_9 = arith.constant 0 : index
      %18 = vector.load %arg4[%c0_8, %c0_9] : memref<1x512xf32, #tpu.memory_space<vmem>>, vector<1x512xf32>
      %19 = vector.broadcast %18 : vector<1x512xf32> to vector<32x512xf32>
      %20 = arith.addf %17, %19 : vector<32x512xf32>
      %21 = arith.truncf %20 : vector<32x512xf32> to vector<32x512xbf16>
      %22 = arith.index_cast %1 : i32 to index
      %c0_10 = arith.constant 0 : index
      %23 = vector.load %arg17[%22, %c0_10] : memref<64x512xbf16, #tpu.memory_space<vmem>>, vector<32x512xbf16>
      tpu.vector_store %arg17[%22, %c0_10], %21 {strides = array<i32>} : memref<64x512xbf16, #tpu.memory_space<vmem>>, vector<32x512xbf16>,
      %c0_11 = arith.constant 0 : index
      %c0_12 = arith.constant 0 : index
      %24 = vector.load %arg19[%c0_11, %c0_12] : memref<1x512xf32, #tpu.memory_space<vmem>>, vector<1x512xf32>
      %cst_13 = arith.constant dense<0.000000e+00> : vector<512xf32>
      %25 = vector.multi_reduction <add>, %20, %cst_13 [0] : vector<32x512xf32> to vector<512xf32>
      %26 = vector.shape_cast %25 : vector<512xf32> to vector<1x512xf32>
      %27 = arith.addf %24, %26 : vector<1x512xf32>
      %c0_14 = arith.constant 0 : index
      %c0_15 = arith.constant 0 : index
      %28 = vector.load %arg19[%c0_14, %c0_15] : memref<1x512xf32, #tpu.memory_space<vmem>>, vector<1x512xf32>
      tpu.vector_store %arg19[%c0_14, %c0_15], %27 {strides = array<i32>} : memref<1x512xf32, #tpu.memory_space<vmem>>, vector<1x512xf32>,
      %c0_16 = arith.constant 0 : index
      %c0_17 = arith.constant 0 : index
      %29 = vector.load %arg20[%c0_16, %c0_17] : memref<1x512xf32, #tpu.memory_space<vmem>>, vector<1x512xf32>
      %30 = arith.mulf %20, %20 : vector<32x512xf32>
      %cst_18 = arith.constant dense<0.000000e+00> : vector<512xf32>
      %31 = vector.multi_reduction <add>, %30, %cst_18 [0] : vector<32x512xf32> to vector<512xf32>
      %32 = vector.shape_cast %31 : vector<512xf32> to vector<1x512xf32>
      %33 = arith.addf %29, %32 : vector<1x512xf32>
      %c0_19 = arith.constant 0 : index
      %c0_20 = arith.constant 0 : index
      %34 = vector.load %arg20[%c0_19, %c0_20] : memref<1x512xf32, #tpu.memory_space<vmem>>, vector<1x512xf32>
      tpu.vector_store %arg20[%c0_19, %c0_20], %33 {strides = array<i32>} : memref<1x512xf32, #tpu.memory_space<vmem>>, vector<1x512xf32>,
    } else {
    }
    %c1_i32 = arith.constant 1 : i32
    %5 = arith.cmpi eq, %arg0, %c1_i32 : i32
    %6 = arith.extui %5 : i1 to i32
    %c0_i32_1 = arith.constant 0 : i32
    %7 = arith.cmpi ne, %6, %c0_i32_1 : i32
    scf.if %7 {
      %c0_i32_3 = arith.constant 0 : i32
      %11 = arith.cmpi eq, %arg1, %c0_i32_3 : i32
      %12 = arith.extui %11 : i1 to i32
      %c0_i32_4 = arith.constant 0 : i32
      %13 = arith.cmpi ne, %12, %c0_i32_4 : i32
      scf.if %13 {
        %c0_26 = arith.constant 0 : index
        %c0_27 = arith.constant 0 : index
        %48 = vector.load %arg19[%c0_26, %c0_27] : memref<1x512xf32, #tpu.memory_space<vmem>>, vector<1x512xf32>
        %c0_28 = arith.constant 0 : index
        %c0_29 = arith.constant 0 : index
        %49 = vector.load %arg20[%c0_28, %c0_29] : memref<1x512xf32, #tpu.memory_space<vmem>>, vector<1x512xf32>
        %c0_30 = arith.constant 0 : index
        %c0_31 = arith.constant 0 : index
        %50 = vector.load %arg5[%c0_30, %c0_31] : memref<1x512xf32, #tpu.memory_space<vmem>>, vector<1x512xf32>
        %c0_32 = arith.constant 0 : index
        %c0_33 = arith.constant 0 : index
        %51 = vector.load %arg6[%c0_32, %c0_33] : memref<1x512xf32, #tpu.memory_space<vmem>>, vector<1x512xf32>
        %cst_34 = arith.constant 1.562500e-02 : f32
        %52 = vector.broadcast %cst_34 : f32 to vector<1x512xf32>
        %53 = arith.mulf %48, %52 : vector<1x512xf32>
        %cst_35 = arith.constant 1.562500e-02 : f32
        %54 = vector.broadcast %cst_35 : f32 to vector<1x512xf32>
        %55 = arith.mulf %49, %54 : vector<1x512xf32>
        %56 = arith.mulf %53, %53 : vector<1x512xf32>
        %57 = arith.subf %55, %56 : vector<1x512xf32>
        %cst_36 = arith.constant 0.000000e+00 : f32
        %58 = vector.broadcast %cst_36 : f32 to vector<1x512xf32>
        %59 = arith.maximumf %57, %58 : vector<1x512xf32>
        %cst_37 = arith.constant 9.99999974E-6 : f32
        %60 = vector.broadcast %cst_37 : f32 to vector<1x512xf32>
        %61 = arith.addf %59, %60 : vector<1x512xf32>
        %62 = math.rsqrt %61 : vector<1x512xf32>
        %63 = arith.mulf %50, %62 : vector<1x512xf32>
        %64 = arith.mulf %53, %63 : vector<1x512xf32>
        %65 = arith.subf %51, %64 : vector<1x512xf32>
        %c0_38 = arith.constant 0 : index
        %c0_39 = arith.constant 0 : index
        %66 = vector.load %arg19[%c0_38, %c0_39] : memref<1x512xf32, #tpu.memory_space<vmem>>, vector<1x512xf32>
        tpu.vector_store %arg19[%c0_38, %c0_39], %63 {strides = array<i32>} : memref<1x512xf32, #tpu.memory_space<vmem>>, vector<1x512xf32>,
        %c0_40 = arith.constant 0 : index
        %c0_41 = arith.constant 0 : index
        %67 = vector.load %arg20[%c0_40, %c0_41] : memref<1x512xf32, #tpu.memory_space<vmem>>, vector<1x512xf32>
        tpu.vector_store %arg20[%c0_40, %c0_41], %65 {strides = array<i32>} : memref<1x512xf32, #tpu.memory_space<vmem>>, vector<1x512xf32>,
      } else {
      }
      %c0 = arith.constant 0 : index
      %c0_5 = arith.constant 0 : index
      %14 = vector.load %arg19[%c0, %c0_5] : memref<1x512xf32, #tpu.memory_space<vmem>>, vector<1x512xf32>
      %c0_6 = arith.constant 0 : index
      %c0_7 = arith.constant 0 : index
      %15 = vector.load %arg20[%c0_6, %c0_7] : memref<1x512xf32, #tpu.memory_space<vmem>>, vector<1x512xf32>
      %16 = arith.index_cast %1 : i32 to index
      %c0_8 = arith.constant 0 : index
      %17 = vector.load %arg17[%16, %c0_8] : memref<64x512xbf16, #tpu.memory_space<vmem>>, vector<32x512xbf16>
      %18 = arith.extf %17 : vector<32x512xbf16> to vector<32x512xf32>
      %19 = vector.broadcast %14 : vector<1x512xf32> to vector<32x512xf32>
      %20 = arith.mulf %18, %19 : vector<32x512xf32>
      %21 = vector.broadcast %15 : vector<1x512xf32> to vector<32x512xf32>
      %22 = arith.addf %20, %21 : vector<32x512xf32>
      %cst = arith.constant 0.000000e+00 : f32
      %23 = vector.broadcast %cst : f32 to vector<32x512xf32>
      %24 = arith.cmpf oge, %22, %23 : vector<32x512xf32>
      %cst_9 = arith.constant 0.00999999977 : f32
      %25 = vector.broadcast %cst_9 : f32 to vector<32x512xf32>
      %26 = arith.mulf %25, %22 : vector<32x512xf32>
      %27 = arith.select %24, %22, %26 : vector<32x512xi1>, vector<32x512xf32>
      %28 = arith.truncf %27 : vector<32x512xf32> to vector<32x512xbf16>
      %c0_10 = arith.constant 0 : index
      %c0_11 = arith.constant 0 : index
      %29 = vector.load %arg7[%c0_10, %c0_11] : memref<512x256xbf16, #tpu.memory_space<vmem>>, vector<512x256xbf16>
      %cst_12 = arith.constant dense<0.000000e+00> : vector<32x256xf32>
      %30 = tpu.matmul %28, %29, %cst_12 {dimension_numbers = #tpu.dot_dimension_numbers<[1], [0], [0], [1], [0, 0, 1, 1], [], []>} : vector<32x512xbf16>, vector<512x256xbf16>, vector<32x256xf32> -> vector<32x256xf32>
      %c0_13 = arith.constant 0 : index
      %c0_14 = arith.constant 0 : index
      %31 = vector.load %arg8[%c0_13, %c0_14] : memref<1x256xf32, #tpu.memory_space<vmem>>, vector<1x256xf32>
      %32 = vector.broadcast %31 : vector<1x256xf32> to vector<32x256xf32>
      %33 = arith.addf %30, %32 : vector<32x256xf32>
      %34 = arith.truncf %33 : vector<32x256xf32> to vector<32x256xbf16>
      %35 = arith.index_cast %1 : i32 to index
      %c0_15 = arith.constant 0 : index
      %36 = vector.load %arg18[%35, %c0_15] : memref<64x256xbf16, #tpu.memory_space<vmem>>, vector<32x256xbf16>
      tpu.vector_store %arg18[%35, %c0_15], %34 {strides = array<i32>} : memref<64x256xbf16, #tpu.memory_space<vmem>>, vector<32x256xbf16>,
      %c0_16 = arith.constant 0 : index
      %c0_17 = arith.constant 0 : index
      %37 = vector.load %arg21[%c0_16, %c0_17] : memref<1x256xf32, #tpu.memory_space<vmem>>, vector<1x256xf32>
      %cst_18 = arith.constant dense<0.000000e+00> : vector<256xf32>
      %38 = vector.multi_reduction <add>, %33, %cst_18 [0] : vector<32x256xf32> to vector<256xf32>
      %39 = vector.shape_cast %38 : vector<256xf32> to vector<1x256xf32>
      %40 = arith.addf %37, %39 : vector<1x256xf32>
      %c0_19 = arith.constant 0 : index
      %c0_20 = arith.constant 0 : index
      %41 = vector.load %arg21[%c0_19, %c0_20] : memref<1x256xf32, #tpu.memory_space<vmem>>, vector<1x256xf32>
      tpu.vector_store %arg21[%c0_19, %c0_20], %40 {strides = array<i32>} : memref<1x256xf32, #tpu.memory_space<vmem>>, vector<1x256xf32>,
      %c0_21 = arith.constant 0 : index
      %c0_22 = arith.constant 0 : index
      %42 = vector.load %arg22[%c0_21, %c0_22] : memref<1x256xf32, #tpu.memory_space<vmem>>, vector<1x256xf32>
      %43 = arith.mulf %33, %33 : vector<32x256xf32>
      %cst_23 = arith.constant dense<0.000000e+00> : vector<256xf32>
      %44 = vector.multi_reduction <add>, %43, %cst_23 [0] : vector<32x256xf32> to vector<256xf32>
      %45 = vector.shape_cast %44 : vector<256xf32> to vector<1x256xf32>
      %46 = arith.addf %42, %45 : vector<1x256xf32>
      %c0_24 = arith.constant 0 : index
      %c0_25 = arith.constant 0 : index
      %47 = vector.load %arg22[%c0_24, %c0_25] : memref<1x256xf32, #tpu.memory_space<vmem>>, vector<1x256xf32>
      tpu.vector_store %arg22[%c0_24, %c0_25], %46 {strides = array<i32>} : memref<1x256xf32, #tpu.memory_space<vmem>>, vector<1x256xf32>,
    } else {
    }
    %c2_i32 = arith.constant 2 : i32
    %8 = arith.cmpi eq, %arg0, %c2_i32 : i32
    %9 = arith.extui %8 : i1 to i32
    %c0_i32_2 = arith.constant 0 : i32
    %10 = arith.cmpi ne, %9, %c0_i32_2 : i32
    scf.if %10 {
      %c0_i32_3 = arith.constant 0 : i32
      %11 = arith.cmpi eq, %arg1, %c0_i32_3 : i32
      %12 = arith.extui %11 : i1 to i32
      %c0_i32_4 = arith.constant 0 : i32
      %13 = arith.cmpi ne, %12, %c0_i32_4 : i32
      scf.if %13 {
        %c0_30 = arith.constant 0 : index
        %c0_31 = arith.constant 0 : index
        %63 = vector.load %arg21[%c0_30, %c0_31] : memref<1x256xf32, #tpu.memory_space<vmem>>, vector<1x256xf32>
        %c0_32 = arith.constant 0 : index
        %c0_33 = arith.constant 0 : index
        %64 = vector.load %arg22[%c0_32, %c0_33] : memref<1x256xf32, #tpu.memory_space<vmem>>, vector<1x256xf32>
        %c0_34 = arith.constant 0 : index
        %c0_35 = arith.constant 0 : index
        %65 = vector.load %arg9[%c0_34, %c0_35] : memref<1x256xf32, #tpu.memory_space<vmem>>, vector<1x256xf32>
        %c0_36 = arith.constant 0 : index
        %c0_37 = arith.constant 0 : index
        %66 = vector.load %arg10[%c0_36, %c0_37] : memref<1x256xf32, #tpu.memory_space<vmem>>, vector<1x256xf32>
        %cst_38 = arith.constant 1.562500e-02 : f32
        %67 = vector.broadcast %cst_38 : f32 to vector<1x256xf32>
        %68 = arith.mulf %63, %67 : vector<1x256xf32>
        %cst_39 = arith.constant 1.562500e-02 : f32
        %69 = vector.broadcast %cst_39 : f32 to vector<1x256xf32>
        %70 = arith.mulf %64, %69 : vector<1x256xf32>
        %71 = arith.mulf %68, %68 : vector<1x256xf32>
        %72 = arith.subf %70, %71 : vector<1x256xf32>
        %cst_40 = arith.constant 0.000000e+00 : f32
        %73 = vector.broadcast %cst_40 : f32 to vector<1x256xf32>
        %74 = arith.maximumf %72, %73 : vector<1x256xf32>
        %cst_41 = arith.constant 9.99999974E-6 : f32
        %75 = vector.broadcast %cst_41 : f32 to vector<1x256xf32>
        %76 = arith.addf %74, %75 : vector<1x256xf32>
        %77 = math.rsqrt %76 : vector<1x256xf32>
        %78 = arith.mulf %65, %77 : vector<1x256xf32>
        %79 = arith.mulf %68, %78 : vector<1x256xf32>
        %80 = arith.subf %66, %79 : vector<1x256xf32>
        %c0_42 = arith.constant 0 : index
        %c0_43 = arith.constant 0 : index
        %81 = vector.load %arg21[%c0_42, %c0_43] : memref<1x256xf32, #tpu.memory_space<vmem>>, vector<1x256xf32>
        tpu.vector_store %arg21[%c0_42, %c0_43], %78 {strides = array<i32>} : memref<1x256xf32, #tpu.memory_space<vmem>>, vector<1x256xf32>,
        %c0_44 = arith.constant 0 : index
        %c0_45 = arith.constant 0 : index
        %82 = vector.load %arg22[%c0_44, %c0_45] : memref<1x256xf32, #tpu.memory_space<vmem>>, vector<1x256xf32>
        tpu.vector_store %arg22[%c0_44, %c0_45], %80 {strides = array<i32>} : memref<1x256xf32, #tpu.memory_space<vmem>>, vector<1x256xf32>,
      } else {
      }
      %c0 = arith.constant 0 : index
      %c0_5 = arith.constant 0 : index
      %14 = vector.load %arg21[%c0, %c0_5] : memref<1x256xf32, #tpu.memory_space<vmem>>, vector<1x256xf32>
      %c0_6 = arith.constant 0 : index
      %c0_7 = arith.constant 0 : index
      %15 = vector.load %arg22[%c0_6, %c0_7] : memref<1x256xf32, #tpu.memory_space<vmem>>, vector<1x256xf32>
      %16 = arith.index_cast %1 : i32 to index
      %c0_8 = arith.constant 0 : index
      %17 = vector.load %arg18[%16, %c0_8] : memref<64x256xbf16, #tpu.memory_space<vmem>>, vector<32x256xbf16>
      %18 = arith.extf %17 : vector<32x256xbf16> to vector<32x256xf32>
      %19 = vector.broadcast %14 : vector<1x256xf32> to vector<32x256xf32>
      %20 = arith.mulf %18, %19 : vector<32x256xf32>
      %21 = vector.broadcast %15 : vector<1x256xf32> to vector<32x256xf32>
      %22 = arith.addf %20, %21 : vector<32x256xf32>
      %cst = arith.constant 0.000000e+00 : f32
      %23 = vector.broadcast %cst : f32 to vector<32x256xf32>
      %24 = arith.cmpf oge, %22, %23 : vector<32x256xf32>
      %cst_9 = arith.constant 0.00999999977 : f32
      %25 = vector.broadcast %cst_9 : f32 to vector<32x256xf32>
      %26 = arith.mulf %25, %22 : vector<32x256xf32>
      %27 = arith.select %24, %22, %26 : vector<32x256xi1>, vector<32x256xf32>
      %28 = arith.truncf %27 : vector<32x256xf32> to vector<32x256xbf16>
      %c0_10 = arith.constant 0 : index
      %c0_11 = arith.constant 0 : index
      %29 = vector.load %arg11[%c0_10, %c0_11] : memref<256x128xbf16, #tpu.memory_space<vmem>>, vector<256x128xbf16>
      %cst_12 = arith.constant dense<0.000000e+00> : vector<32x128xf32>
      %30 = tpu.matmul %28, %29, %cst_12 {dimension_numbers = #tpu.dot_dimension_numbers<[1], [0], [0], [1], [0, 0, 1, 1], [], []>} : vector<32x256xbf16>, vector<256x128xbf16>, vector<32x128xf32> -> vector<32x128xf32>
      %c0_13 = arith.constant 0 : index
      %c0_14 = arith.constant 0 : index
      %31 = vector.load %arg12[%c0_13, %c0_14] : memref<1x128xf32, #tpu.memory_space<vmem>>, vector<1x128xf32>
      %32 = vector.broadcast %31 : vector<1x128xf32> to vector<32x128xf32>
      %33 = arith.addf %30, %32 : vector<32x128xf32>
      %cst_15 = arith.constant 0.000000e+00 : f32
      %34 = vector.broadcast %cst_15 : f32 to vector<32x128xf32>
      %35 = arith.cmpf oge, %33, %34 : vector<32x128xf32>
      %cst_16 = arith.constant 0.00999999977 : f32
      %36 = vector.broadcast %cst_16 : f32 to vector<32x128xf32>
      %37 = arith.mulf %36, %33 : vector<32x128xf32>
      %38 = arith.select %35, %33, %37 : vector<32x128xi1>, vector<32x128xf32>
      %39 = arith.truncf %38 : vector<32x128xf32> to vector<32x128xbf16>
      %c0_17 = arith.constant 0 : index
      %c0_18 = arith.constant 0 : index
      %40 = vector.load %arg13[%c0_17, %c0_18] : memref<128x128xbf16, #tpu.memory_space<vmem>>, vector<128x128xbf16>
      %cst_19 = arith.constant dense<0.000000e+00> : vector<32x128xf32>
      %41 = tpu.matmul %39, %40, %cst_19 {dimension_numbers = #tpu.dot_dimension_numbers<[1], [0], [0], [1], [0, 0, 1, 1], [], []>} : vector<32x128xbf16>, vector<128x128xbf16>, vector<32x128xf32> -> vector<32x128xf32>
      %c0_20 = arith.constant 0 : index
      %c0_21 = arith.constant 0 : index
      %42 = vector.load %arg14[%c0_20, %c0_21] : memref<1x128xf32, #tpu.memory_space<vmem>>, vector<1x128xf32>
      %43 = vector.broadcast %42 : vector<1x128xf32> to vector<32x128xf32>
      %44 = arith.addf %41, %43 : vector<32x128xf32>
      %45 = arith.mulf %33, %33 : vector<32x128xf32>
      %cst_22 = arith.constant dense<0.000000e+00> : vector<32xf32>
      %46 = vector.multi_reduction <add>, %45, %cst_22 [1] : vector<32x128xf32> to vector<32xf32>
      %47 = vector.shape_cast %46 : vector<32xf32> to vector<32x1xf32>
      %cst_23 = arith.constant 1.000000e-24 : f32
      %48 = vector.broadcast %cst_23 : f32 to vector<32x1xf32>
      %49 = arith.maximumf %47, %48 : vector<32x1xf32>
      %50 = math.rsqrt %49 : vector<32x1xf32>
      %51 = vector.broadcast %50 : vector<32x1xf32> to vector<32x128xf32>
      %52 = arith.mulf %33, %51 : vector<32x128xf32>
      %c0_24 = arith.constant 0 : index
      %c0_25 = arith.constant 0 : index
      %53 = vector.load %arg15[%c0_24, %c0_25] : memref<32x128xf32, #tpu.memory_space<vmem>>, vector<32x128xf32>
      tpu.vector_store %arg15[%c0_24, %c0_25], %52 {strides = array<i32>} : memref<32x128xf32, #tpu.memory_space<vmem>>, vector<32x128xf32>,
      %54 = arith.mulf %44, %44 : vector<32x128xf32>
      %cst_26 = arith.constant dense<0.000000e+00> : vector<32xf32>
      %55 = vector.multi_reduction <add>, %54, %cst_26 [1] : vector<32x128xf32> to vector<32xf32>
      %56 = vector.shape_cast %55 : vector<32xf32> to vector<32x1xf32>
      %cst_27 = arith.constant 1.000000e-24 : f32
      %57 = vector.broadcast %cst_27 : f32 to vector<32x1xf32>
      %58 = arith.maximumf %56, %57 : vector<32x1xf32>
      %59 = math.rsqrt %58 : vector<32x1xf32>
      %60 = vector.broadcast %59 : vector<32x1xf32> to vector<32x128xf32>
      %61 = arith.mulf %44, %60 : vector<32x128xf32>
      %c0_28 = arith.constant 0 : index
      %c0_29 = arith.constant 0 : index
      %62 = vector.load %arg16[%c0_28, %c0_29] : memref<32x128xf32, #tpu.memory_space<vmem>>, vector<32x128xf32>
      tpu.vector_store %arg16[%c0_28, %c0_29], %61 {strides = array<i32>} : memref<32x128xf32, #tpu.memory_space<vmem>>, vector<32x128xf32>,
    } else {
    }
    return
  }
  func.func @transform_0(%arg0: i32, %arg1: i32) -> (i32, i32) {
    %c0_i32 = arith.constant 0 : i32
    %0 = arith.cmpi eq, %arg0, %c0_i32 : i32
    %c1_i32 = arith.constant 1 : i32
    %1 = arith.select %0, %arg1, %c1_i32 : i32
    %c0_i32_0 = arith.constant 0 : i32
    %c0_i32_1 = arith.constant 0 : i32
    return %1, %c0_i32_0 : i32, i32
  }
  func.func @transform_1(%arg0: i32, %arg1: i32) -> (i32, i32) {
    %c0_i32 = arith.constant 0 : i32
    %c0_i32_0 = arith.constant 0 : i32
    %c0_i32_1 = arith.constant 0 : i32
    return %c0_i32, %c0_i32_0 : i32, i32
  }
  func.func @transform_2(%arg0: i32, %arg1: i32) -> (i32, i32) {
    %c0_i32 = arith.constant 0 : i32
    %c0_i32_0 = arith.constant 0 : i32
    %c0_i32_1 = arith.constant 0 : i32
    return %c0_i32, %c0_i32_0 : i32, i32
  }
  func.func @transform_3(%arg0: i32, %arg1: i32) -> (i32, i32) {
    %c0_i32 = arith.constant 0 : i32
    %c0_i32_0 = arith.constant 0 : i32
    %c0_i32_1 = arith.constant 0 : i32
    return %c0_i32, %c0_i32_0 : i32, i32
  }
  func.func @transform_4(%arg0: i32, %arg1: i32) -> (i32, i32) {
    %c0_i32 = arith.constant 0 : i32
    %c0_i32_0 = arith.constant 0 : i32
    %c0_i32_1 = arith.constant 0 : i32
    return %c0_i32, %c0_i32_0 : i32, i32
  }
  func.func @transform_5(%arg0: i32, %arg1: i32) -> (i32, i32) {
    %c0_i32 = arith.constant 0 : i32
    %c0_i32_0 = arith.constant 0 : i32
    %c0_i32_1 = arith.constant 0 : i32
    return %c0_i32, %c0_i32_0 : i32, i32
  }
  func.func @transform_6(%arg0: i32, %arg1: i32) -> (i32, i32) {
    %c0_i32 = arith.constant 0 : i32
    %c0_i32_0 = arith.constant 0 : i32
    %c0_i32_1 = arith.constant 0 : i32
    return %c0_i32, %c0_i32_0 : i32, i32
  }
  func.func @transform_7(%arg0: i32, %arg1: i32) -> (i32, i32) {
    %c0_i32 = arith.constant 0 : i32
    %c0_i32_0 = arith.constant 0 : i32
    %c0_i32_1 = arith.constant 0 : i32
    return %c0_i32, %c0_i32_0 : i32, i32
  }
  func.func @transform_8(%arg0: i32, %arg1: i32) -> (i32, i32) {
    %c0_i32 = arith.constant 0 : i32
    %c0_i32_0 = arith.constant 0 : i32
    %c0_i32_1 = arith.constant 0 : i32
    return %c0_i32, %c0_i32_0 : i32, i32
  }
  func.func @transform_9(%arg0: i32, %arg1: i32) -> (i32, i32) {
    %c0_i32 = arith.constant 0 : i32
    %c0_i32_0 = arith.constant 0 : i32
    %c0_i32_1 = arith.constant 0 : i32
    return %c0_i32, %c0_i32_0 : i32, i32
  }
  func.func @transform_10(%arg0: i32, %arg1: i32) -> (i32, i32) {
    %c0_i32 = arith.constant 0 : i32
    %c0_i32_0 = arith.constant 0 : i32
    %c0_i32_1 = arith.constant 0 : i32
    return %c0_i32, %c0_i32_0 : i32, i32
  }
  func.func @transform_11(%arg0: i32, %arg1: i32) -> (i32, i32) {
    %c0_i32 = arith.constant 0 : i32
    %c0_i32_0 = arith.constant 0 : i32
    %c0_i32_1 = arith.constant 0 : i32
    return %c0_i32, %c0_i32_0 : i32, i32
  }
  func.func @transform_12(%arg0: i32, %arg1: i32) -> (i32, i32) {
    %c0_i32 = arith.constant 0 : i32
    %c0_i32_0 = arith.constant 0 : i32
    %c0_i32_1 = arith.constant 0 : i32
    return %c0_i32, %c0_i32_0 : i32, i32
  }
  func.func @transform_13(%arg0: i32, %arg1: i32) -> (i32, i32) {
    %c2_i32 = arith.constant 2 : i32
    %0 = arith.cmpi eq, %arg0, %c2_i32 : i32
    %c0_i32 = arith.constant 0 : i32
    %1 = arith.select %0, %arg1, %c0_i32 : i32
    %c0_i32_0 = arith.constant 0 : i32
    %c0_i32_1 = arith.constant 0 : i32
    return %1, %c0_i32_0 : i32, i32
  }
  func.func @transform_14(%arg0: i32, %arg1: i32) -> (i32, i32) {
    %c2_i32 = arith.constant 2 : i32
    %0 = arith.cmpi eq, %arg0, %c2_i32 : i32
    %c0_i32 = arith.constant 0 : i32
    %1 = arith.select %0, %arg1, %c0_i32 : i32
    %c0_i32_0 = arith.constant 0 : i32
    %c0_i32_1 = arith.constant 0 : i32
    return %1, %c0_i32_0 : i32, i32
  }
}

</mosaic_0001>

<bundles_post_ra>
// kernel: tpu_custom_call.1
= control target key start
LH: loop header
LB: loop body
LE: loop exit
PB: predicated region body
PF: predicated region fallthrough
CT: control target
= control target key end

     0   :  { %s4198_s0 = inlined_call_operand.hbm [shape: f32[64,64], index: 0, kind: input, shape index: {}]   ;;  %s4199_s1 = inlined_call_operand.hbm [shape: bf16[64,512], index: 1, kind: input, shape index: {}]   ;;  %s4200_s2 = inlined_call_operand.hbm [shape: f32[1,512], index: 2, kind: input, shape index: {}]   ;;  %s4201_s3 = inlined_call_operand.vmem [shape: f32[1,512], index: 3, kind: input, shape index: {}]   ;;  %s4202_s4 = inlined_call_operand.hbm [shape: f32[1,512], index: 4, kind: input, shape index: {}]   ;;  %s4203_s5 = inlined_call_operand.hbm [shape: bf16[512,256], index: 5, kind: input, shape index: {}]   ;;  %s4204_s6 = inlined_call_operand.vmem [shape: f32[1,256], index: 6, kind: input, shape index: {}]   ;;  %s4205_s7 = inlined_call_operand.vmem [shape: f32[1,256], index: 7, kind: input, shape index: {}]   ;;  %s4206_s8 = inlined_call_operand.vmem [shape: f32[1,256], index: 8, kind: input, shape index: {}]   ;;  %s4207_s9 = inlined_call_operand.hbm [shape: bf16[256,128], index: 9, kind: input, shape index: {}]   ;;  %s4208_s10 = inlined_call_operand.vmem [shape: f32[1,128], index: 10, kind: input, shape index: {}]   ;;  %s4209_s11 = inlined_call_operand.hbm [shape: bf16[128,128], index: 11, kind: input, shape index: {}]   ;;  %s4210_s12 = inlined_call_operand.vmem [shape: f32[1,128], index: 12, kind: input, shape index: {}]   ;;  %s4211_s13 = inlined_call_operand.hbm [shape: f32[64,128], index: 13, kind: output, shape index: {0}]   ;;  %s4212_s14 = inlined_call_operand.hbm [shape: f32[64,128], index: 14, kind: output, shape index: {1}]  }
   0x1   :  { %4223 = sst [smem:[#allocation32_spill]] %s4199_s1 }
   0x2   :  { %4224 = sst [smem:[#allocation33_spill]] %s4200_s2 }
   0x3   :  { %4225 = sst [smem:[#allocation34_spill]] %s4201_s3 }
   0x4   :  { %4226 = sst [smem:[#allocation35_spill]] %s4202_s4 }
   0x5   :  { %4227 = sst [smem:[#allocation36_spill]] %s4203_s5 }
   0x6   :  { %4228 = sst [smem:[#allocation37_spill]] %s4204_s6 }
   0x7   :  { %4229 = sst [smem:[#allocation38_spill]] %s4205_s7 }
   0x8   :  { %4230 = sst [smem:[#allocation39_spill]] %s4206_s8 }
   0x9   :  { %4231 = sst [smem:[#allocation40_spill]] %s4207_s9 }
   0xa   :  { %4232 = sst [smem:[#allocation41_spill]] %s4208_s10 }
   0xb   :  { %4233 = sst [smem:[#allocation42_spill]] %s4209_s11 }
   0xc   :  { %4234 = sst [smem:[#allocation43_spill]] %s4210_s12 }
   0xd   :  { %4235 = sst [smem:[#allocation44_spill]] %s4211_s13 }
   0xe   :  { %4236 = sst [smem:[#allocation45_spill]] %s4212_s14 }
   0xf   :  { %20 = vsyncpa [#allocation9], 0 }
  0x10   :  { %22 = vsyncpa [#allocation9 + $0x1], 0 }
  0x11   :  { %23 = vsyncpa [#allocation12], 0 }
  0x12   :  { %24 = vsyncpa [#allocation15], 0 }
  0x13   :  { %25 = vsyncpa [#allocation18], 0 }
  0x14   :  { %26 = vsyncpa [#allocation10], 0 }
  0x15   :  { %28 = vsyncpa [#allocation10 + $0x1], 0 }
  0x16   :  { %29 = vsyncpa [#allocation22], 0 }
  0x17   :  { %31 = vsyncpa [#allocation22 + $0x1], 0  ;;  %s3641_s29 = smov 0   ;;  %s3643_s30 = smov 0  }
  0x18   :  { %s3645_s15 = smov 0   ;;  %s3647_s16 = smov 0  }
  0x19   :  { %s3649_s17 = smov 0   ;;  %s3651_s18 = smov 0  }
  0x1a   :  { %s3653_s19 = smov 0   ;;  %s3655_s20 = smov 0  }
  0x1b   :  { %s3657_s21 = smov 0   ;;  %s3659_s22 = smov 0  }
  0x1c   :  { %s3661_s23 = smov 0  }
  0x1d LB: > { %4237 = sst [smem:[#allocation29_spill]] %s3531_s20  ;;  %s4214_s24 = sadd.s32 4294967295, %s3543_s23   ;;  %s3543_s23 = sphi %s3661_s23, %s37_s23   ;;  %s3539_s22 = sphi %s3659_s22, %s4285_s22   ;;  %s3535_s21 = sphi %s3657_s21, %s4284_s21   ;;  %s3531_s20 = sphi %s3655_s20, %s4283_s20   ;;  %s3527_s19 = sphi %s3653_s19, %s4282_s19   ;;  %s3523_s18 = sphi %s3651_s18, %s4281_s18   ;;  %s3519_s17 = sphi %s3649_s17, %s4280_s17   ;;  %s3515_s16 = sphi %s3647_s16, %s4279_s16   ;;  %s3511_s15 = sphi %s3645_s15, %s4278_s15   ;;  %s3507_s30 = sphi %s3643_s30, %s4277_s30   ;;  %s3503_s29 = sphi %s3641_s29, %s4276_s29  }
  0x1e   : > { %p2610_p0 = scmp.ge.s32.totalorder %s3543_s23, 1  ;;  %p3700_p1 = scmp.eq.s32.totalorder %s4214_s24, 0 }
  0x1f   : > { %p396_p2 = scmp.lt.s32.totalorder %s3543_s23, 7  ;;  %s3545_s27 = smov [#allocation11]  }
  0x20   : > { %s4238_s25 = scalar_select %p3700_p1, 1, 0 }
  0x21   : > { %p3705_p3 = pnand %p2610_p0, %p396_p2  ;;  %s408_s28 = sshll.u32 %s3545_s27, 4  ;;  %s409_s28 = int_to_ptr.vmem [resolvable:$true] %s408_s28 }
  0x22   : > { %s3546_s24 = smov [#allocation14]   ;;  %s3547_s12 = smov [#allocation17]  }
  0x23   : > { %s4239_s26 = scalar_select %p3705_p3, 1, 0 }
  0x24   : > { %p2883_p4 = pneg %p3705_p3  ;;  %s436_s13 = sshll.u32 %s3546_s24, 4  ;;  %s437_s13 = int_to_ptr.vmem [resolvable:$true] %s436_s13 }
  0x25   : > { %s468_s10 = sshll.u32 %s3547_s12, 4  ;;  %s3208_s27 = scalar_lea.vmem %s409_s28, 2048  ;;  %s469_s10 = int_to_ptr.vmem [resolvable:$true] %s468_s10 }
  0x26   : > { %p3713_p5 = pnand %p2883_p4, %p3700_p1  ;;  %p3209_p7 = scmp.ne.s32.totalorder %s409_s28, %s3208_s27 }
  0x27   : > { %p3216_p10 = scmp.lt.s32.totalorder %s409_s28, %s409_s28  ;;  %p3217_p11 = scmp.lt.s32.totalorder %s3208_s27, %s3208_s27 }
  0x28   : > { %p3719_p6 = pneg %p3713_p5 }
  0x29   : > { %p3218_p12 = por %p3217_p11, %p3216_p10 }
  0x2a   : > { %p3211_p8 = pnand %p3209_p7, %p3719_p6 }
  0x2c   : > { %p3212_p9 = pneg %p3211_p8 }
  0x2e   : > { %p3219_p13 = pnand %p3218_p12, %p3212_p9 }
  0x30   : > { %3222 = shalt.err (!%p3219_p13)
}
  0x31   : > { %s3548_s24 = smov 256   ;;  %s3549_s12 = smov 16  }
  0x32   : > { %s4242_s1 = sld [smem:[#allocation32_spill]]  ;;  %s3234_s3 = scalar_lea.vmem %s437_s13, 64 }
  0x33   : > { %p3235_p0 = scmp.ne.s32.totalorder %s437_s13, %s3234_s3  ;;  %p3242_p7 = scmp.lt.s32.totalorder %s437_s13, %s437_s13 }
  0x34   : > { %p3243_p8 = scmp.lt.s32.totalorder %s3234_s3, %s3234_s3 }
  0x35   : > { %p3237_p2 = pnand %p3235_p0, %p3719_p6 }
  0x36   : > { %p3244_p3 = por %p3243_p8, %p3242_p7 }
  0x37   : > { %p3238_p4 = pneg %p3237_p2 }
  0x38   : > { %2886 = dma.hbm_to_vmem [thread:$0]  (!%p3713_p5), %s4242_s1, 2048, %s409_s28, [#allocation12], %s3548_s24, %s3548_s24, %s3549_s12  }
  0x39   : > { %p3245_p10 = pnand %p3244_p3, %p3238_p4 }
  0x3b   : > { %3248 = shalt.err (!%p3245_p10)
}
  0x3c   : > { %s4243_s4 = sld [smem:[#allocation35_spill]]  ;;  %s3260_s6 = scalar_lea.vmem %s469_s10, 2048 }
  0x3d   : > { %p3261_p9 = scmp.ne.s32.totalorder %s469_s10, %s3260_s6  ;;  %p3268_p13 = scmp.lt.s32.totalorder %s469_s10, %s469_s10 }
  0x3e   : > { %p3269_p0 = scmp.lt.s32.totalorder %s3260_s6, %s3260_s6 }
  0x3f   : > { %p3263_p11 = pnand %p3261_p9, %p3719_p6 }
  0x40   : > { %p3270_p2 = por %p3269_p0, %p3268_p13 }
  0x41   : > { %p3264_p12 = pneg %p3263_p11 }
  0x42   : > { %2892 = dma.hbm_to_vmem [thread:$0]  (!%p3713_p5), %s4243_s4, 64, %s437_s13, [#allocation15]  }
  0x43   : > { %p3271_p1 = pnand %p3270_p2, %p3264_p12 }
  0x45   : > { %3274 = shalt.err (!%p3271_p1)
}
  0x46   : > { %s3550_s3 = smov 64   ;;  %s3551_s7 = smov 4  }
  0x47   : > { %s4244_s9 = sld [smem:[#allocation40_spill]]  ;;  %s3552_s28 = smov [#allocation13]  }
  0x48   : > { %s422_s24 = sshll.u32 %s3552_s28, 4  ;;  %s3553_s12 = smov [#allocation16]   ;;  %s423_s24 = int_to_ptr.vmem [resolvable:$true] %s422_s24 }
  0x49   : > { %s446_s27 = sshll.u32 %s3553_s12, 4  ;;  %s3286_s6 = scalar_lea.vmem %s423_s24, 64  ;;  %s447_s27 = int_to_ptr.vmem [resolvable:$true] %s446_s27 }
  0x4a   : > { %p3287_p3 = scmp.ne.s32.totalorder %s423_s24, %s3286_s6  ;;  %p3294_p7 = scmp.lt.s32.totalorder %s423_s24, %s423_s24 }
  0x4b   : > { %p3295_p8 = scmp.lt.s32.totalorder %s3286_s6, %s3286_s6 }
  0x4c   : > { %p3289_p1 = pnand %p3287_p3, %p3719_p6 }
  0x4d   : > { %2898 = dma.hbm_to_vmem [thread:$0]  (!%p3713_p5), %s4244_s9, 2048, %s469_s10, [#allocation18], %s3550_s3, %s3550_s3, %s3551_s7  }
  0x4e   : > { %p3290_p4 = pneg %p3289_p1  ;;  %p3296_p10 = por %p3295_p8, %p3294_p7 }
  0x50   : > { %p3297_p9 = pnand %p3296_p10, %p3290_p4 }
  0x52   : > { %3300 = shalt.err (!%p3297_p9)
}
  0x53   : > { %s4245_s2 = sld [smem:[#allocation33_spill]]  ;;  %s3312_s10 = scalar_lea.vmem %s447_s27, 8192 }
  0x54   : > { %p3313_p11 = scmp.ne.s32.totalorder %s447_s27, %s3312_s10  ;;  %p3320_p0 = scmp.lt.s32.totalorder %s447_s27, %s447_s27 }
  0x55   : > { %p3321_p2 = scmp.lt.s32.totalorder %s3312_s10, %s3312_s10 }
  0x56   : > { %p3315_p12 = pnand %p3313_p11, %p3719_p6 }
  0x57   : > { %p3322_p3 = por %p3321_p2, %p3320_p0 }
  0x58   : > { %p3316_p13 = pneg %p3315_p12 }
  0x59   : > { %2889 = dma.hbm_to_vmem [thread:$0]  (!%p3713_p5), %s4245_s2, 64, %s423_s24, [#allocation12]  }
  0x5a   : > { %p3323_p1 = pnand %p3322_p3, %p3316_p13 }
  0x5c   : > { %3326 = shalt.err (!%p3323_p1)
}
  0x5d   : > { %s4219_s20 = smov 128   ;;  %s4220_s28 = smov 8  }
  0x5e   : > { %s4246_s5 = sld [smem:[#allocation36_spill]]  ;;  %s3556_s12 = smov [#allocation19]  }
  0x5f   : > { %s484_s6 = sshll.u32 %s3556_s12, 4  ;;  %s485_s6 = int_to_ptr.vmem [resolvable:$true] %s484_s6 }
  0x60   : > { %s3338_s13 = scalar_lea.vmem %s485_s6, 1024  ;;  %p3346_p10 = scmp.lt.s32.totalorder %s485_s6, %s485_s6 }
  0x61   : > { %p3339_p4 = scmp.ne.s32.totalorder %s485_s6, %s3338_s13  ;;  %p3347_p9 = scmp.lt.s32.totalorder %s3338_s13, %s3338_s13 }
  0x63   : > { %p3341_p7 = pnand %p3339_p4, %p3719_p6  ;;  %p3348_p11 = por %p3347_p9, %p3346_p10 }
  0x64   : > { %2895 = dma.hbm_to_vmem [thread:$0]  (!%p3713_p5), %s4246_s5, 8192, %s447_s27, [#allocation15], %s4219_s20, %s4219_s20, %s4220_s28  }
  0x65   : > { %p3342_p8 = pneg %p3341_p7 }
  0x67   : > { %p3349_p12 = pnand %p3348_p11, %p3342_p8 }
  0x69   : > { %3352 = shalt.err (!%p3349_p12)
}
  0x6a   : > { %s4247_s11 = sld [smem:[#allocation42_spill]]  ;;  %s46_s14 = sadd.s32 1, %s3535_s21 }
  0x6b   : > { %p47_p6 = scmp.ge.s32.totalorder %s46_s14, 2  ;;  %s49_s1 = sadd.s32 1, %s3539_s22 }
  0x6c   : > { %p53_p13 = scmp.eq.s32.totalorder %s3539_s22, 0  ;;  %s60_s24 = sadd.s32 1, %s3523_s18 }
  0x6d   : > { %s4287_s14 = smov (%p47_p6, %s46_s14), 0  ;;  %s4289_s1 = smov (!%p47_p6, %s49_s1), %s3539_s22 }
  0x6e   : > { %4248 = sst [smem:[#allocation30_spill]] %s4287_s14  ;;  %p67_p0 = scmp.ne.s32.totalorder %s3523_s18, %s3519_s17 }
  0x6f   : > { %s3783_s12 = scalar_select %p53_p13, %s3535_s21, 1 }
  0x70   : > { %2901 = dma.hbm_to_vmem [thread:$0]  (!%p3713_p5), %s4247_s11, 1024, %s485_s6, [#allocation18], %s3550_s3, %s3550_s3, %s3551_s7  }
  0x71   : > { %p51_p5 = scmp.ge.s32.totalorder %s4289_s1, 3  ;;  %p68_p2 = scmp.eq.s32.totalorder %s3543_s23, 0 }
  0x72   : > { %p73_p3 = scmp.ne.s32.totalorder %s3519_s17, %s3515_s16  ;;  %p4251_p4 = scmp.ne.s32.totalorder %s4238_s25, 0 }
  0x73   : > { %s4291_s1 = smov (%p51_p5, %s4289_s1), 0  ;;  %p3792_p1 = por %p68_p2, %p67_p0 }
  0x74   : > { %4249 = sst [smem:[#allocation31_spill]] %s4291_s1  ;;  %p3798_p7 = por %p4251_p4, %p73_p3 }
  0x75   : > { %p55_p8 = scmp.eq.s32.totalorder %s4291_s1, 0  ;;  %p335_p10 = scmp.eq.s32.totalorder %s3539_s22, 2 }
  0x76   : > { %p337_p9 = scmp.eq.s32.totalorder %s4291_s1, 2  ;;  %s342_s16 = sadd.s32 1, %s3511_s15 }
  0x77   : > { %s56_s6 = scalar_select %p55_p8, %s4287_s14, 1 }
  0x78   : > { %s336_s13 = scalar_select %p335_p10, %s3535_s21, 0 }
  0x79   : > { %s57_s10 = ssub.s32 %s3783_s12, %s56_s6  ;;  %p352_p11 = scmp.ne.s32.totalorder %s3511_s15, %s3507_s30 }
  0x7a   : > { %p58_p12 = scmp.eq.s32.totalorder %s57_s10, 0  ;;  %s4253_s27 = sadd.s32 4294967295, %s3543_s23  }
  0x7b   : > { %p353_p6 = scmp.eq.s32.totalorder %s4253_s27, 5  ;;  %p358_p0 = scmp.ne.s32.totalorder %s3507_s30, %s3503_s29 }
  0x7c   : > { %s338_s20 = scalar_select %p337_p9, %s4287_s14, 0 }
  0x7d   : > { %s3815_s28 = scalar_select %p58_p12, %s3523_s18, %s60_s24  }
  0x7e   : > { %s339_s8 = ssub.s32 %s336_s13, %s338_s20  ;;  %p3817_p13 = por %p353_p6, %p352_p11 }
  0x7f   : > { %p340_p5 = scmp.eq.s32.totalorder %s339_s8, 0  ;;  %s4255_s4 = sadd.s32 4294967294, %s3543_s23  }
  0x80   : > { %p359_p2 = scmp.eq.s32.totalorder %s4255_s4, 5  ;;  %p2919_p3 = scmp.lt.s32.totalorder %s3543_s23, 6 }
  0x81   : > { %s3827_s6 = scalar_select %p340_p5, %s3511_s15, %s342_s16  }
  0x82   : > { %p3829_p4 = por %p359_p2, %p358_p0  ;;  %s501_s27 = sand.u32 1, %s3523_s18  }
  0x83   : > { %s2618_s24 = sshll.u32 %s501_s27, 5  ;;  %s2776_s5 = sshll.u32 %s3783_s12, 9 }
  0x84   : > { %s513_s13 = scalar_lea.hbm %s4198_s0, %s2776_s5  ;;  %s505_s11 = scalar_lea.vmem [#allocation8], %s2618_s24 }
  0x85   : > { %s514_s1 = sshll.u32 %s505_s11, 4  ;;  %p3840_p8 = pnand %p2919_p3, %p3792_p1  ;;  %s515_s1 = int_to_ptr.vmem [resolvable:$true] %s514_s1 }
  0x86   : > { %s502_s8 = scalar_lea.sflag [#allocation9], %s501_s27  ;;  %s3366_s16 = scalar_lea.vmem %s515_s1, 512 }
  0x87   : > { %p3355_p10 = pneg %p3840_p8  ;;  %p3367_p9 = scmp.ne.s32.totalorder %s515_s1, %s3366_s16 }
  0x88   : > { %s3557_s12 = smov [#allocation8]  }
  0x89   : > { %p3369_p11 = pnand %p3367_p9, %p3355_p10  ;;  %s3371_s14 = sshll.u32 %s3557_s12, 4  ;;  %s3372_s14 = int_to_ptr.vmem [resolvable:$false] %s3371_s14 }
  0x8a   : > { %s3373_s5 = scalar_lea.vmem %s3372_s14, 1024  ;;  %p3374_p6 = scmp.lt.s32.totalorder %s515_s1, %s3372_s14 }
  0x8b   : > { %p3370_p12 = pneg %p3369_p11  ;;  %p3375_p5 = scmp.lt.s32.totalorder %s3373_s5, %s3366_s16 }
  0x8d   : > { %p3376_p0 = por %p3375_p5, %p3374_p6 }
  0x8f   : > { %p3377_p2 = pnand %p3376_p0, %p3370_p12 }
  0x91   : > { %3380 = shalt.err (!%p3377_p2)
}
  0x92   : > { %s4258_s9 = smov 8   ;;  %s4259_s11 = smov 128  }
  0x93   : > { %2905 = dma.hbm_to_vmem [thread:$0]  (!%p3840_p8), %s513_s13, 512, %s515_s1, %s502_s8, %s4259_s11, %s4259_s11, %s4258_s9  }
  0x94   : > { %p4260_p1 = scmp.ne.s32.totalorder %s4239_s26, 0 }
  0x95   : > { %s528_s3 = sand.u32 (!%p4260_p1), 1, %s3519_s17  }
  0x96   : > { %526 = sbr.rel (%p4260_p1) target bundleno = 1512 (0x5e8), region = 72  ;;  %s2622_s27 = sshll.u32 (!%p4260_p1), %s528_s3, 5 }
  0x97   : > { %s529_s24 = scalar_lea.sflag (!%p4260_p1), [#allocation9], %s528_s3  ;;  %s3854_s20 = scalar_lea.vmem (!%p4260_p1), [#allocation8], %s2622_s27 }
  0x9b   : > { %3478 = dma.done.wait (%p3798_p7), %s529_s24, 512  }
  0x9c   : > { %3480 = vsyncadd (%p3798_p7), %s529_s24, 4294966784  ;;  %p4261_p3 = scmp.ne.s32.totalorder %s4238_s25, 0 }
  0x9e   : > { %3482 = dma.done.wait (%p4261_p3), [#allocation12], 2112  }
  0x9f   : > { %3484 = vsyncadd (%p4261_p3), [#allocation12], 4294965184 }
  0xa0   : > { %3486 = dma.done.wait (%p4261_p3), [#allocation15], 8256  }
  0xa1   : > { %3488 = vsyncadd (%p4261_p3), [#allocation15], 4294959040 }
  0xa2   : > { %3490 = dma.done.wait (%p4261_p3), [#allocation18], 3072  }
  0xa3   : > { %3492 = vsyncadd (%p4261_p3), [#allocation18], 4294964224  ;;  %s3873_s26 = sand.u32 1, %s3507_s30   ;;  %s3876_s14 = sshll.u32 %s3527_s19, 5 }
  0xa4   : > { %s2629_s1 = sshll.u32 %s3873_s26, 5  ;;  %s4262_s4 = sld [smem:[#allocation29_spill]] }
  0xa5   : > { %s3879_s7 = scalar_lea.vmem [#allocation20], %s2629_s1  ;;  %s3881_s13 = scalar_lea.vmem [#allocation21], %s2629_s1 }
  0xaa   : > { %p2632_p7 = scmp.ne.s32.totalorder %s4262_s4, 0 }
  0xab   : > { %p2633_p8 = scmp.ne.s32.totalorder (!%p2632_p7), %s3527_s19, 0 }
  0xac   : > { %620 = sbr.rel (%p2632_p7) target bundleno = 445 (0x1bd), region = 104 }
  0xb1   : > { %624 = sbr.rel (%p2633_p8) target bundleno = 187 (0xbb), region = 108 }
  0xb6   : > { %v625_v0 = vlaneseq  ;;  %v3558_v1 = vmov 0.0  }
  0xb8   : > { %vm627_vm0 = vcmp.lt.s32.totalorder %v625_v0, 512  ;;  %vm631_vm1 = vcmp.lt.s32.totalorder %v625_v0, 256 }
  0xb9   : > { %629 = vst.msk [vmem:[#allocation4] sm:$0xf] %vm627_vm0, %v3558_v1  ;;  %630 = vst.msk [vmem:[#allocation5] sm:$0xf] %vm627_vm0, %v3558_v1 }
  0xba   : > { %633 = vst.msk [vmem:[#allocation6] sm:$0x3] %vm631_vm1, %v3558_v1  ;;  %634 = vst.msk [vmem:[#allocation7] sm:$0x3] %vm631_vm1, %v3558_v1 }
  0xbb PF: > { %v3033_v2 = vld [vmem:[#allocation11 + $0x64] ss:$16 sps:$4 sm:$0xff]   ;;  %v3035_v3 = vld [vmem:[#allocation11 + $0x6c] ss:$16 sps:$4 sm:$0xff]   ;;  %v3559_v4 = vmov 0   ;;  %vm759_vm2 = vcmask 523264   ;;  %v659_v25 = vlaneseq }
  0xbc   : > { %798 = vmatprep.mubr.bf16.mxu0 %v3559_v4  ;;  %851 = vmatprep.mubr.bf16.mxu1 %v3559_v4  ;;  %v3037_v5 = vld [vmem:[#allocation11 + $0x60] ss:$16 sps:$4 sm:$0xff]   ;;  %v3038_v6 = vld [vmem:[#allocation11 + $0x68] ss:$16 sps:$4 sm:$0xff]   ;;  %v3039_v7 = vld [vmem:[#allocation11 + $0x44] ss:$16 sps:$4 sm:$0xff]  }
  0xbd   : > { %774 = vmatprep.subr.bf16.mxu0 %v3033_v2  ;;  %827 = vmatprep.subr.bf16.mxu1 %v3035_v3  ;;  %v3041_v8 = vld [vmem:[#allocation11 + $0x4c] ss:$16 sps:$4 sm:$0xff]   ;;  %v3043_v9 = vld [vmem:[#allocation11 + $0x40] ss:$16 sps:$4 sm:$0xff]   ;;  %v3044_v10 = vld [vmem:[#allocation11 + $0x48] ss:$16 sps:$4 sm:$0xff]  }
  0xbe   : > { %775 = vmatpush1.bf16.msra.mxu0 %v3037_v5  ;;  %828 = vmatpush1.bf16.msra.mxu1 %v3038_v6  ;;  %v3045_v11 = vld [vmem:[#allocation11 + $0x24] ss:$16 sps:$4 sm:$0xff]   ;;  %v3047_v12 = vld [vmem:[#allocation11 + $0x2c] ss:$16 sps:$4 sm:$0xff]   ;;  %v3049_v13 = vld [vmem:[#allocation11 + $0x20] ss:$16 sps:$4 sm:$0xff]  }
  0xbf   : > { %776 = vmatprep.subr.bf16.mxu0 %v3039_v7  ;;  %829 = vmatprep.subr.bf16.mxu1 %v3041_v8  ;;  %v3050_v14 = vld [vmem:[#allocation11 + $0x28] ss:$16 sps:$4 sm:$0xff]   ;;  %v3051_v15 = vld [vmem:[#allocation11 + $0x4] ss:$16 sps:$4 sm:$0xff]   ;;  %v3053_v16 = vld [vmem:[#allocation11 + $0xc] ss:$16 sps:$4 sm:$0xff]  }
  0xc0   : > { %v3055_v17 = vld [vmem:[#allocation11] ss:$16 sps:$4 sm:$0xff]   ;;  %v3056_v18 = vld [vmem:[#allocation11 + $0x8] ss:$16 sps:$4 sm:$0xff]   ;;  %v3890_v26 = vshrl.u32 %v659_v25, 7  ;;  %s920_s25 = sshra.s32 %s3876_s14, 3 }
  0xc1   : > { %v635_v19 = vld [vmem:[%s3854_s20] sm:$0xff]  ;;  %v636_v20 = vld [vmem:[%s3854_s20 + $0x8] sm:$0xff]  ;;  %v637_v22 = vld [vmem:[%s3854_s20 + $0x10] sm:$0xff]  ;;  %s2785_s8 = sshll.u32 %s920_s25, 4  ;;  %v3560_v40 = vmov 1966171168  }
  0xc2   : > { %777 = vmatpush1.bf16.msra.mxu0 %v3043_v9  ;;  %830 = vmatpush1.bf16.msra.mxu1 %v3044_v10  ;;  %v639_v21 = vpack.c.bf16 %v636_v20, %v635_v19  ;;  %v638_v23 = vld [vmem:[%s3854_s20 + $0x18] sm:$0xff]  ;;  %v661_v27 = vsub.s32 0, %v3890_v26  ;;  %v657_v28 = vld [vmem:[#allocation13] sm:$0xf]  ;;  %v669_v29 = vsub.s32 2, %v3890_v26  ;;  %v665_v30 = vsub.s32 1, %v3890_v26 }
  0xc3   : > { %778 = vmatprep.subr.bf16.mxu0 %v3045_v11  ;;  %831 = vmatprep.subr.bf16.mxu1 %v3047_v12  ;;  %v640_v24 = vpack.c.bf16 %v638_v23, %v637_v22  ;;  %v673_v31 = vsub.s32 3, %v3890_v26  ;;  %v3905_v41 = vunpack.c.l.s4 %v3560_v40  ;;  %s3913_s16 = scalar_lea.vmem [#allocation2], %s2785_s8  ;;  %vm1002_vm3 = vcmp.lt.s32.totalorder %v659_v25, 512 }
  0xc4   : > { %v3896_v32 = vrot.slane %v657_v28, %v661_v27  ;;  %v3899_v33 = vrot.slane %v657_v28, %v669_v29  ;;  %v3901_v34 = vrot.slane %v657_v28, %v665_v30 }
  0xc5   : > { %v3903_v35 = vrot.slane %v657_v28, %v673_v31  ;;  %v978_v56 = vunpack.c.0.s8 %v3905_v41 }
  0xc6   : > { %779 = vmatpush1.bf16.msra.mxu0 %v3049_v13  ;;  %832 = vmatpush1.bf16.msra.mxu1 %v3050_v14 }
  0xc7   : > { %780 = vmatprep.subr.bf16.mxu0 %v3051_v15  ;;  %833 = vmatprep.subr.bf16.mxu1 %v3053_v16 }
  0xca   : > { %781 = vmatpush1.bf16.msra.mxu0 %v3055_v17  ;;  %834 = vmatpush1.bf16.msra.mxu1 %v3056_v18 }
  0xcd   : > { %2650 = vmatmul.mubr.msk.bf16.vlgmr.msra.gmra.mxu0 %vm759_vm2, %v639_v21  ;;  %2652 = vmatmul.mubr.msk.bf16.vlgmr.msra.gmra.mxu1 %vm759_vm2, %v639_v21 }
  0xce   : > { %808 = vmatprep.mubr.bf16.mxu0 %v3559_v4  ;;  %861 = vmatprep.mubr.bf16.mxu1 %v3559_v4 }
  0xd5   : > { %2651 = vmatmul.mubr.msk.bf16.gmra.mxu0 %vm759_vm2, %v640_v24  ;;  %2653 = vmatmul.mubr.msk.bf16.gmra.mxu1 %vm759_vm2, %v640_v24 }
 0x18d   : > { %v800_v36 = vpop.f32.mrf.mxu0  ;;  %v853_v37 = vpop.f32.mrf.mxu1 }
 0x18e   : > { %v801_v42 = vadd.f32 %v800_v36, %v3896_v32  ;;  %v854_v43 = vadd.f32 %v853_v37, %v3899_v33 }
 0x18f   : > { %v802_v38 = vpop.f32.mrf.mxu0  ;;  %v855_v39 = vpop.f32.mrf.mxu1 }
 0x190   : > { %v803_v44 = vadd.f32 %v802_v38, %v3901_v34  ;;  %v856_v45 = vadd.f32 %v855_v39, %v3903_v35  ;;  %v1006_v57 = vmul.f32 %v801_v42, %v801_v42  ;;  %v1008_v58 = vmul.f32 %v854_v43, %v854_v43 }
 0x191   : > { %v804_v46 = vpop.f32.mrf.mxu0  ;;  %v857_v47 = vpop.f32.mrf.mxu1 }
 0x192   : > { %v2777_v48 = vpack.c.bf16 %v803_v44, %v801_v42  ;;  %v2778_v49 = vpack.c.bf16 %v856_v45, %v854_v43  ;;  %v805_v50 = vadd.f32 %v804_v46, %v3896_v32  ;;  %v858_v51 = vadd.f32 %v857_v47, %v3899_v33 }
 0x193   : > { %v806_v52 = vpop.f32.mrf.mxu0  ;;  %v859_v53 = vpop.f32.mrf.mxu1  ;;  %v1007_v63 = vmul.f32 %v803_v44, %v803_v44  ;;  %v1009_v3 = vmul.f32 %v856_v45, %v856_v45 }
 0x194   : > { %925 = vst [vmem:[%s3913_s16] sm:$0xff] %v2777_v48  ;;  %926 = vst [vmem:[%s3913_s16 + $0x8] sm:$0xff] %v2778_v49  ;;  %v807_v54 = vadd.f32 %v806_v52, %v3901_v34  ;;  %v860_v55 = vadd.f32 %v859_v53, %v3903_v35  ;;  %v1010_v59 = vmul.f32 %v805_v50, %v805_v50 }
 0x195   : > { %v1012_v60 = vmul.f32 %v858_v51, %v858_v51  ;;  %v810_v61 = vpop.f32.mrf.mxu0  ;;  %v863_v62 = vpop.f32.mrf.mxu1  ;;  %v934_v4 = vadd.f32 %v805_v50, %v801_v42  ;;  %v952_v5 = vadd.f32 %v858_v51, %v854_v43 }
 0x196   : > { %v2779_v0 = vpack.c.bf16 %v807_v54, %v805_v50  ;;  %v1011_v1 = vmul.f32 %v807_v54, %v807_v54  ;;  %v2780_v2 = vpack.c.bf16 %v860_v55, %v858_v51  ;;  %v1013_v6 = vmul.f32 %v860_v55, %v860_v55 }
 0x197   : > { %v812_v7 = vpop.f32.mrf.mxu0  ;;  %v865_v8 = vpop.f32.mrf.mxu1  ;;  %v943_v9 = vadd.f32 %v807_v54, %v803_v44  ;;  %v811_v10 = vadd.f32 %v810_v61, %v3896_v32  ;;  %v864_v11 = vadd.f32 %v863_v62, %v3899_v33  ;;  %v1022_v13 = vadd.f32 %v1010_v59, %v1006_v57 }
 0x198   : > { %927 = vst [vmem:[%s3913_s16 + $0x10] sm:$0xff] %v2779_v0  ;;  %928 = vst [vmem:[%s3913_s16 + $0x18] sm:$0xff] %v2780_v2  ;;  %v813_v12 = vadd.f32 %v812_v7, %v3901_v34  ;;  %v1040_v14 = vadd.f32 %v1012_v60, %v1008_v58  ;;  %v961_v15 = vadd.f32 %v860_v55, %v856_v45 }
 0x199   : > { %v866_v16 = vadd.f32 %v865_v8, %v3903_v35  ;;  %v814_v17 = vpop.f32.mrf.mxu0  ;;  %v867_v18 = vpop.f32.mrf.mxu1  ;;  %v1031_v19 = vadd.f32 %v1011_v1, %v1007_v63  ;;  %v1049_v20 = vadd.f32 %v1013_v6, %v1009_v3  ;;  %v1014_v21 = vmul.f32 %v811_v10, %v811_v10 }
 0x19a   : > { %v1016_v22 = vmul.f32 %v864_v11, %v864_v11  ;;  %v935_v23 = vadd.f32 %v934_v4, %v811_v10  ;;  %v2781_v24 = vpack.c.bf16 %v813_v12, %v811_v10  ;;  %v1015_v27 = vmul.f32 %v813_v12, %v813_v12 }
 0x19b   : > { %v2782_v28 = vpack.c.bf16 %v866_v16, %v864_v11  ;;  %v816_v29 = vpop.f32.mrf.mxu0  ;;  %v869_v30 = vpop.f32.mrf.mxu1  ;;  %v1023_v31 = vadd.f32 %v1022_v13, %v1014_v21  ;;  %v953_v36 = vadd.f32 %v952_v5, %v864_v11  ;;  %v944_v37 = vadd.f32 %v943_v9, %v813_v12 }
 0x19c   : > { %v1017_v38 = vmul.f32 %v866_v16, %v866_v16  ;;  %v1041_v39 = vadd.f32 %v1040_v14, %v1016_v22  ;;  %929 = vst [vmem:[%s3913_s16 + $0x20] sm:$0xff] %v2781_v24  ;;  %v815_v40 = vadd.f32 %v814_v17, %v3896_v32  ;;  %v868_v42 = vadd.f32 %v867_v18, %v3899_v33 }
 0x19d   : > { %930 = vst [vmem:[%s3913_s16 + $0x28] sm:$0xff] %v2782_v28  ;;  %v817_v43 = vadd.f32 %v816_v29, %v3901_v34  ;;  %v1032_v44 = vadd.f32 %v1031_v19, %v1015_v27  ;;  %v962_v45 = vadd.f32 %v961_v15, %v866_v16  ;;  %v870_v47 = vadd.f32 %v869_v30, %v3903_v35 }
 0x19e   : > { %v1050_v46 = vadd.f32 %v1049_v20, %v1017_v38  ;;  %v936_v48 = vadd.f32 %v935_v23, %v815_v40  ;;  %v1018_v49 = vmul.f32 %v815_v40, %v815_v40  ;;  %v954_v50 = vadd.f32 %v953_v36, %v868_v42 }
 0x19f   : > { %v1020_v51 = vmul.f32 %v868_v42, %v868_v42  ;;  %v2783_v52 = vpack.c.bf16 %v817_v43, %v815_v40  ;;  %v945_v53 = vadd.f32 %v944_v37, %v817_v43  ;;  %v1019_v54 = vmul.f32 %v817_v43, %v817_v43 }
 0x1a0   : > { %v2784_v55 = vpack.c.bf16 %v870_v47, %v868_v42  ;;  %v937_v32 = vrot.slane %v936_v48, 4  ;;  %v1024_v57 = vadd.f32 %v1023_v31, %v1018_v49  ;;  %v955_v33 = vrot.slane %v954_v50, 4 }
 0x1a1   : > { %v1042_v58 = vadd.f32 %v1041_v39, %v1020_v51  ;;  %931 = vst [vmem:[%s3913_s16 + $0x30] sm:$0xff] %v2783_v52  ;;  %v946_v34 = vrot.slane %v945_v53, 4  ;;  %v1033_v59 = vadd.f32 %v1032_v44, %v1019_v54  ;;  %v963_v60 = vadd.f32 %v962_v45, %v870_v47 }
 0x1a2   : > { %932 = vst [vmem:[%s3913_s16 + $0x38] sm:$0xff] %v2784_v55  ;;  %v1021_v61 = vmul.f32 %v870_v47, %v870_v47  ;;  %v938_v35 = vadd.f32 %v937_v32, %v936_v48  ;;  %v1025_v62 = vrot.slane %v1024_v57, 4  ;;  %v956_v63 = vadd.f32 %v955_v33, %v954_v50 }
 0x1a3   : > { %v1043_v0 = vrot.slane %v1042_v58, 4  ;;  %v947_v1 = vadd.f32 %v946_v34, %v945_v53  ;;  %v1034_v2 = vrot.slane %v1033_v59, 4  ;;  %v964_v3 = vrot.slane %v963_v60, 4  ;;  %v1005_v34 = vld [vmem:[#allocation5] sm:$0xf] }
 0x1a4   : > { %v1051_v4 = vadd.f32 %v1050_v46, %v1021_v61  ;;  %v939_v5 = vrot.slane %v938_v35, 2  ;;  %v1026_v6 = vadd.f32 %v1025_v62, %v1024_v57  ;;  %v957_v7 = vrot.slane %v956_v63, 2 }
 0x1a5   : > { %v1044_v8 = vadd.f32 %v1043_v0, %v1042_v58  ;;  %v948_v9 = vrot.slane %v947_v1, 2  ;;  %v1035_v10 = vadd.f32 %v1034_v2, %v1033_v59  ;;  %v965_v11 = vadd.f32 %v964_v3, %v963_v60 }
 0x1a6   : > { %v1052_v12 = vrot.slane %v1051_v4, 4  ;;  %v940_v13 = vadd.f32 %v939_v5, %v938_v35  ;;  %v1027_v14 = vrot.slane %v1026_v6, 2  ;;  %v958_v15 = vadd.f32 %v957_v7, %v956_v63 }
 0x1a7   : > { %v1045_v16 = vrot.slane %v1044_v8, 2  ;;  %v949_v17 = vadd.f32 %v948_v9, %v947_v1  ;;  %v1036_v18 = vrot.slane %v1035_v10, 2  ;;  %v966_v19 = vrot.slane %v965_v11, 2 }
 0x1a8   : > { %v1053_v20 = vadd.f32 %v1052_v12, %v1051_v4  ;;  %v941_v21 = vrot.slane %v940_v13, 1  ;;  %v1028_v22 = vadd.f32 %v1027_v14, %v1026_v6  ;;  %v959_v23 = vrot.slane %v958_v15, 1 }
 0x1a9   : > { %v1046_v24 = vadd.f32 %v1045_v16, %v1044_v8  ;;  %v950_v27 = vrot.slane %v949_v17, 1  ;;  %v1037_v28 = vadd.f32 %v1036_v18, %v1035_v10  ;;  %v967_v29 = vadd.f32 %v966_v19, %v965_v11 }
 0x1aa   : > { %v1054_v30 = vrot.slane %v1053_v20, 2  ;;  %v942_v31 = vadd.f32 %v941_v21, %v940_v13  ;;  %v1029_v36 = vrot.slane %v1028_v22, 1  ;;  %v981_v38 = vsub.s32 %v978_v56, %v3890_v26  ;;  %v933_v56 = vld [vmem:[#allocation4] sm:$0xf] }
 0x1ab   : > { %v1047_v37 = vrot.slane %v1046_v24, 1  ;;  %v951_v39 = vadd.f32 %v950_v27, %v949_v17  ;;  %v1038_v40 = vrot.slane %v1037_v28, 1  ;;  %v968_v42 = vrot.slane %v967_v29, 1 }
 0x1ac   : > { %v1055_v43 = vadd.f32 %v1054_v30, %v1053_v20  ;;  %v1030_v44 = vadd.f32 %v1029_v36, %v1028_v22  ;;  %v960_v45 = vadd.f32 %v959_v23, %v958_v15 }
 0x1ad   : > { %v974_v46 = vcombine.low %v942_v31, %v951_v39  ;;  %v1039_v47 = vadd.f32 %v1038_v40, %v1037_v28  ;;  %v969_v48 = vadd.f32 %v968_v42, %v967_v29  ;;  %v1048_v50 = vadd.f32 %v1047_v37, %v1046_v24 }
 0x1ae   : > { %v1056_v49 = vrot.slane %v1055_v43, 1 }
 0x1af   : > { %v982_v51 = vrot.slane %v974_v46, %v981_v38  ;;  %v1062_v52 = vcombine.low %v1030_v44, %v1039_v47  ;;  %v975_v53 = vcombine.low %v960_v45, %v969_v48 }
 0x1b0   : > { %v1057_v54 = vadd.f32 %v1056_v49, %v1055_v43 }
 0x1b1   : > { %v1070_v55 = vrot.slane %v1062_v52, %v981_v38  ;;  %v989_v32 = vrot.slane %v975_v53, %v981_v38 }
 0x1b2   : > { %v1063_v57 = vcombine.low %v1048_v50, %v1057_v54 }
 0x1b3   : > { %v990_v41 = vcombine.low %v982_v51, %v989_v32 }
 0x1b4   : > { %v1077_v26 = vrot.slane %v1063_v57, %v981_v38 }
 0x1b5   : > { %v997_v33 = vrot.slane %v990_v41, %v981_v38 }
 0x1b6   : > { %v1078_v58 = vcombine.low %v1070_v55, %v1077_v26 }
 0x1b7   : > { %v999_v59 = vadd.f32 %v997_v33, %v933_v56 }
 0x1b8   : > { %v1085_v60 = vrot.slane %v1078_v58, %v981_v38 }
 0x1b9   : > { %1004 = vst.msk [vmem:[#allocation4] sm:$0xf] %vm1002_vm3, %v999_v59 }
 0x1ba   : > { %v1087_v61 = vadd.f32 %v1085_v60, %v1005_v34 }
 0x1bc   : > { %1088 = vst.msk [vmem:[#allocation5] sm:$0xf] %vm1002_vm3, %v1087_v61 }
 0x1bd PF: > { %s4263_s12 = sld [smem:[#allocation29_spill]] }
 0x1c3   : > { %p2664_p10 = scmp.ne.s32.totalorder %s4263_s12, 1 }
 0x1c4   : > { %p2665_p9 = scmp.ne.s32.totalorder (!%p2664_p10), %s3527_s19, 0 }
 0x1c5   : > { %1092 = sbr.rel (%p2664_p10) target bundleno = 797 (0x31d), region = 112 }
 0x1ca   : > { %1096 = sbr.rel (%p2665_p9) target bundleno = 495 (0x1ef), region = 116  ;;  %s4264_s11 = sld [smem:[#allocation34_spill]] (!%p2665_p9) }
 0x1cf   : > { %v1097_v35 = vld [vmem:[#allocation4] sm:$0xf]  ;;  %v1098_v62 = vld [vmem:[#allocation5] sm:$0xf]  ;;  %v1111_v4 = vlaneseq  ;;  %v1100_v8 = vld [vmem:[#allocation14] sm:$0xf] }
 0x1d0   : > { %v1101_v63 = vmul.f32 0.015625, %v1097_v35  ;;  %v1102_v0 = vmul.f32 0.015625, %v1098_v62  ;;  %v1099_v5 = vld [vmem:[%s4264_s11] sm:$0xf] }
 0x1d1   : > { %vm1113_vm4 = vcmp.lt.s32.totalorder %v1111_v4, 512 }
 0x1d2   : > { %v1103_v1 = vmul.f32 %v1101_v63, %v1101_v63 }
 0x1d4   : > { %v1104_v2 = vsub.f32 %v1102_v0, %v1103_v1 }
 0x1d6   : > { %v1105_v25 = vmax.f32 %v1104_v2, 0.0 }
 0x1d8   : > { %v1106_v3 = vadd.f32 1e-05, %v1105_v25 }
 0x1da   : > { %3057 = vrsqrt.f32 %v1106_v3 }
 0x1e7   : > { %v3058_v6 = vpop.eup %3057 }
 0x1e8   : > { %v1108_v7 = vmul.f32 %v3058_v6, %v1099_v5 }
 0x1ea   : > { %v1109_v9 = vmul.f32 %v1108_v7, %v1101_v63  ;;  %1115 = vst.msk [vmem:[#allocation4] sm:$0xf] %vm1113_vm4, %v1108_v7 }
 0x1ec   : > { %v1110_v10 = vsub.f32 %v1100_v8, %v1109_v9 }
 0x1ee   : > { %1116 = vst.msk [vmem:[#allocation5] sm:$0xf] %vm1113_vm4, %v1110_v10 }
 0x1ef PF: > { %v3059_v11 = vld [vmem:[#allocation16 + $0x74] ss:$8 sps:$4 sm:$0xff]   ;;  %v3063_v13 = vld [vmem:[#allocation16 + $0x70] ss:$8 sps:$4 sm:$0xff]   ;;  %v3065_v15 = vld [vmem:[#allocation16 + $0x64] ss:$8 sps:$4 sm:$0xff]   ;;  %v1149_v52 = vlaneseq }
 0x1f0   : > { %v3061_v12 = vld [vmem:[#allocation16 + $0x174] ss:$8 sps:$4 sm:$0xff]   ;;  %1674 = vmatprep.subr.bf16.mxu0 %v3059_v11  ;;  %v3064_v14 = vld [vmem:[#allocation16 + $0x170] ss:$8 sps:$4 sm:$0xff]   ;;  %v3067_v16 = vld [vmem:[#allocation16 + $0x164] ss:$8 sps:$4 sm:$0xff]  }
 0x1f1   : > { %1727 = vmatprep.subr.bf16.mxu1 %v3061_v12  ;;  %1675 = vmatpush1.bf16.msra.mxu0 %v3063_v13  ;;  %v3069_v17 = vld [vmem:[#allocation16 + $0x60] ss:$8 sps:$4 sm:$0xff]   ;;  %v3071_v19 = vld [vmem:[#allocation16 + $0x54] ss:$8 sps:$4 sm:$0xff]   ;;  %v3075_v21 = vld [vmem:[#allocation16 + $0x50] ss:$8 sps:$4 sm:$0xff]  }
 0x1f2   : > { %1728 = vmatpush1.bf16.msra.mxu1 %v3064_v14  ;;  %1676 = vmatprep.subr.bf16.mxu0 %v3065_v15  ;;  %v3070_v18 = vld [vmem:[#allocation16 + $0x160] ss:$8 sps:$4 sm:$0xff]   ;;  %v3073_v20 = vld [vmem:[#allocation16 + $0x154] ss:$8 sps:$4 sm:$0xff]   ;;  %v3076_v22 = vld [vmem:[#allocation16 + $0x150] ss:$8 sps:$4 sm:$0xff]  }
 0x1f3   : > { %1729 = vmatprep.subr.bf16.mxu1 %v3067_v16  ;;  %v3077_v23 = vld [vmem:[#allocation16 + $0x44] ss:$8 sps:$4 sm:$0xff]   ;;  %v3081_v27 = vld [vmem:[#allocation16 + $0x40] ss:$8 sps:$4 sm:$0xff]   ;;  %v3083_v29 = vld [vmem:[#allocation16 + $0x34] ss:$8 sps:$4 sm:$0xff]  }
 0x1f4   : > { %v3079_v24 = vld [vmem:[#allocation16 + $0x144] ss:$8 sps:$4 sm:$0xff]   ;;  %v3082_v28 = vld [vmem:[#allocation16 + $0x140] ss:$8 sps:$4 sm:$0xff]   ;;  %v3085_v30 = vld [vmem:[#allocation16 + $0x134] ss:$8 sps:$4 sm:$0xff]  }
 0x1f5   : > { %1677 = vmatpush1.bf16.msra.mxu0 %v3069_v17  ;;  %v3087_v31 = vld [vmem:[#allocation16 + $0x30] ss:$8 sps:$4 sm:$0xff]   ;;  %v3089_v37 = vld [vmem:[#allocation16 + $0x24] ss:$8 sps:$4 sm:$0xff]   ;;  %v3093_v39 = vld [vmem:[#allocation16 + $0x20] ss:$8 sps:$4 sm:$0xff]  }
 0x1f6   : > { %1730 = vmatpush1.bf16.msra.mxu1 %v3070_v18  ;;  %1678 = vmatprep.subr.bf16.mxu0 %v3071_v19  ;;  %v3088_v36 = vld [vmem:[#allocation16 + $0x130] ss:$8 sps:$4 sm:$0xff]   ;;  %v3091_v38 = vld [vmem:[#allocation16 + $0x124] ss:$8 sps:$4 sm:$0xff]   ;;  %v3094_v40 = vld [vmem:[#allocation16 + $0x120] ss:$8 sps:$4 sm:$0xff]  }
 0x1f7   : > { %1731 = vmatprep.subr.bf16.mxu1 %v3073_v20  ;;  %v3095_v42 = vld [vmem:[#allocation16 + $0x14] ss:$8 sps:$4 sm:$0xff]   ;;  %v3099_v44 = vld [vmem:[#allocation16 + $0x10] ss:$8 sps:$4 sm:$0xff]   ;;  %v3101_v46 = vld [vmem:[#allocation16 + $0x4] ss:$8 sps:$4 sm:$0xff]  }
 0x1f8   : > { %v3097_v43 = vld [vmem:[#allocation16 + $0x114] ss:$8 sps:$4 sm:$0xff]   ;;  %v3100_v45 = vld [vmem:[#allocation16 + $0x110] ss:$8 sps:$4 sm:$0xff]   ;;  %v3103_v47 = vld [vmem:[#allocation16 + $0x104] ss:$8 sps:$4 sm:$0xff]  }
 0x1f9   : > { %1679 = vmatpush1.bf16.msra.mxu0 %v3075_v21  ;;  %v3105_v48 = vld [vmem:[#allocation16] ss:$8 sps:$4 sm:$0xff]   ;;  %v3107_v50 = vld [vmem:[#allocation16 + $0xf4] ss:$8 sps:$4 sm:$0xff]   ;;  %v3111_v53 = vld [vmem:[#allocation16 + $0xf0] ss:$8 sps:$4 sm:$0xff]  }
 0x1fa   : > { %1732 = vmatpush1.bf16.msra.mxu1 %v3076_v22  ;;  %1680 = vmatprep.subr.bf16.mxu0 %v3077_v23  ;;  %v3106_v49 = vld [vmem:[#allocation16 + $0x100] ss:$8 sps:$4 sm:$0xff]   ;;  %v3109_v51 = vld [vmem:[#allocation16 + $0x1f4] ss:$8 sps:$4 sm:$0xff]   ;;  %v3112_v54 = vld [vmem:[#allocation16 + $0x1f0] ss:$8 sps:$4 sm:$0xff]  }
 0x1fb   : > { %1733 = vmatprep.subr.bf16.mxu1 %v3079_v24  ;;  %v3113_v55 = vld [vmem:[#allocation16 + $0xe4] ss:$8 sps:$4 sm:$0xff]   ;;  %s1119_s3 = sshra.s32 %s3876_s14, 3  ;;  %v3945_v57 = vshrl.u32 %v1149_v52, 7  ;;  %v3117_v41 = vld [vmem:[#allocation16 + $0xe0] ss:$8 sps:$4 sm:$0xff]  }
 0x1fc   : > { %v3115_v32 = vld [vmem:[#allocation16 + $0x1e4] ss:$8 sps:$4 sm:$0xff]   ;;  %v3118_v26 = vld [vmem:[#allocation16 + $0x1e0] ss:$8 sps:$4 sm:$0xff]   ;;  %v3119_v56 = vld [vmem:[#allocation16 + $0xd4] ss:$8 sps:$4 sm:$0xff]  }
 0x1fd   : > { %1681 = vmatpush1.bf16.msra.mxu0 %v3081_v27  ;;  %v3121_v33 = vld [vmem:[#allocation16 + $0x1d4] ss:$8 sps:$4 sm:$0xff]   ;;  %s2786_s27 = sshll.u32 %s1119_s3, 4  ;;  %v3948_v58 = vsub.s32 1, %v3945_v57  ;;  %v1163_v34 = vsub.s32 3, %v3945_v57  ;;  %v3952_v61 = vsub.s32 0, %v3945_v57 }
 0x1fe   : > { %1734 = vmatpush1.bf16.msra.mxu1 %v3082_v28  ;;  %1682 = vmatprep.subr.bf16.mxu0 %v3083_v29  ;;  %v3123_v59 = vld [vmem:[#allocation16 + $0xd0] ss:$8 sps:$4 sm:$0xff]   ;;  %v1159_v35 = vsub.s32 2, %v3945_v57  ;;  %v3125_v62 = vld [vmem:[#allocation16 + $0xc4] ss:$8 sps:$4 sm:$0xff]   ;;  %s3957_s24 = scalar_lea.vmem [#allocation2], %s2786_s27 }
 0x1ff   : > { %1735 = vmatprep.subr.bf16.mxu1 %v3085_v30  ;;  %v3124_v60 = vld [vmem:[#allocation16 + $0x1d0] ss:$8 sps:$4 sm:$0xff]   ;;  %v3127_v63 = vld [vmem:[#allocation16 + $0x1c4] ss:$8 sps:$4 sm:$0xff]   ;;  %v3129_v0 = vld [vmem:[#allocation16 + $0xc0] ss:$8 sps:$4 sm:$0xff]  }
 0x200   : > { %v1117_v1 = vld [vmem:[#allocation4] sm:$0xf]  ;;  %v3955_v2 = vld [vmem:[#allocation5] sm:$0xf]  ;;  %v1126_v3 = vld [vmem:[%s3957_s24 + $0x10] sm:$0xff]  ;;  %s4265_s4 = sld [smem:[#allocation37_spill]] }
 0x201   : > { %1683 = vmatpush1.bf16.msra.mxu0 %v3087_v31  ;;  %v1124_v25 = vld [vmem:[%s3957_s24] sm:$0xff]  ;;  %v3962_v4 = vrot.slane %v1117_v1, %v3948_v58  ;;  %v3964_v5 = vrot.slane %v1117_v1, %v1163_v34  ;;  %v3967_v6 = vrot.slane %v1117_v1, %v3952_v61  ;;  %v3971_v7 = vrot.slane %v1117_v1, %v1159_v35  ;;  %v3130_v8 = vld [vmem:[#allocation16 + $0x1c0] ss:$8 sps:$4 sm:$0xff]   ;;  %v3974_v13 = vld [vmem:[%s3957_s24 + $0x8] sm:$0xff]  ;;  %s4062_s25 = scalar_lea.vmem [#allocation3], %s3876_s14 }
 0x202   : > { %1736 = vmatpush1.bf16.msra.mxu1 %v3088_v36  ;;  %1684 = vmatprep.subr.bf16.mxu0 %v3089_v37  ;;  %v1132_v9 = vunpack.c.l.bf16 %v1124_v25  ;;  %v1133_v10 = vunpack.c.h.bf16 %v1124_v25  ;;  %v1136_v11 = vunpack.c.l.bf16 %v1126_v3  ;;  %v1137_v12 = vunpack.c.h.bf16 %v1126_v3  ;;  %v3977_v14 = vld [vmem:[%s3957_s24 + $0x18] sm:$0xff]  ;;  %v3131_v15 = vld [vmem:[#allocation16 + $0xb4] ss:$8 sps:$4 sm:$0xff]   ;;  %v3987_v21 = vld [vmem:[%s3957_s24 + $0x20] sm:$0xff] }
 0x203   : > { %1737 = vmatprep.subr.bf16.mxu1 %v3091_v38  ;;  %v3133_v16 = vld [vmem:[#allocation16 + $0x1b4] ss:$8 sps:$4 sm:$0xff]   ;;  %v3981_v17 = vrot.slane %v3955_v2, %v3948_v58  ;;  %v1134_v18 = vunpack.c.l.bf16 %v3974_v13  ;;  %v1135_v19 = vunpack.c.h.bf16 %v3974_v13  ;;  %v1138_v20 = vunpack.c.l.bf16 %v3977_v14  ;;  %v3135_v37 = vld [vmem:[#allocation16 + $0xb0] ss:$8 sps:$4 sm:$0xff]  }
 0x204   : > { %v1170_v22 = vmul.f32 %v3962_v4, %v1133_v10  ;;  %v1174_v23 = vmul.f32 %v3962_v4, %v1137_v12  ;;  %v1139_v24 = vunpack.c.h.bf16 %v3977_v14  ;;  %v3993_v27 = vrot.slane %v3955_v2, %v1163_v34  ;;  %v3996_v28 = vld [vmem:[%s3957_s24 + $0x30] sm:$0xff]  ;;  %v3136_v38 = vld [vmem:[#allocation16 + $0x1b0] ss:$8 sps:$4 sm:$0xff]  }
 0x205   : > { %1685 = vmatpush1.bf16.msra.mxu0 %v3093_v39  ;;  %v1172_v29 = vmul.f32 %v3964_v5, %v1135_v19  ;;  %v1169_v30 = vmul.f32 %v3967_v6, %v1132_v9  ;;  %v1173_v31 = vmul.f32 %v3967_v6, %v1136_v11  ;;  %v4003_v36 = vrot.slane %v3955_v2, %v3952_v61  ;;  %v3147_v13 = vld [vmem:[#allocation16 + $0x90] ss:$8 sps:$4 sm:$0xff]  }
 0x206   : > { %1738 = vmatpush1.bf16.msra.mxu1 %v3094_v40  ;;  %1686 = vmatprep.subr.bf16.mxu0 %v3095_v42  ;;  %v1207_v39 = vadd.f32 %v3981_v17, %v1170_v22  ;;  %v1211_v40 = vadd.f32 %v3981_v17, %v1174_v23  ;;  %v1176_v42 = vmul.f32 %v3964_v5, %v1139_v24  ;;  %v3148_v14 = vld [vmem:[#allocation16 + $0x190] ss:$8 sps:$4 sm:$0xff]   ;;  %v1140_v23 = vunpack.c.l.bf16 %v3987_v21  ;;  %v3153_v24 = vld [vmem:[#allocation16 + $0x80] ss:$8 sps:$4 sm:$0xff]  }
 0x207   : > { %1739 = vmatprep.subr.bf16.mxu1 %v3097_v43  ;;  %v1141_v43 = vunpack.c.h.bf16 %v3987_v21  ;;  %v1171_v3 = vmul.f32 %v3971_v7, %v1134_v18  ;;  %v4028_v10 = vrot.slane %v3955_v2, %v1159_v35  ;;  %v3151_v35 = vld [vmem:[#allocation16 + $0x184] ss:$8 sps:$4 sm:$0xff]  }
 0x208   : > { %vm1223_vm5 = vcmp.ge.f32.partialorder %v1207_v39, 0.0  ;;  %vm1227_vm6 = vcmp.ge.f32.partialorder %v1211_v40, 0.0 }
 0x209   : > { %1687 = vmatpush1.bf16.msra.mxu0 %v3099_v44  ;;  %v3137_v44 = vld [vmem:[#allocation16 + $0xa4] ss:$8 sps:$4 sm:$0xff]   ;;  %v1178_v11 = vmul.f32 %v3962_v4, %v1141_v43  ;;  %v1208_v22 = vadd.f32 %v4028_v10, %v1171_v3 }
 0x20a   : > { %1740 = vmatpush1.bf16.msra.mxu1 %v3100_v45  ;;  %1688 = vmatprep.subr.bf16.mxu0 %v3101_v46  ;;  %v3139_v45 = vld [vmem:[#allocation16 + $0x1a4] ss:$8 sps:$4 sm:$0xff]   ;;  %v1209_v46 = vadd.f32 %v3993_v27, %v1172_v29  ;;  %v3154_v29 = vld [vmem:[#allocation16 + $0x180] ss:$8 sps:$4 sm:$0xff]  }
 0x20b   : > { %1741 = vmatprep.subr.bf16.mxu1 %v3103_v47  ;;  %v1206_v47 = vadd.f32 %v4003_v36, %v1169_v30  ;;  %v1215_v30 = vadd.f32 %v3981_v17, %v1178_v11  ;;  %vm1224_vm11 = vcmp.ge.f32.partialorder %v1208_v22, 0.0 }
 0x20c   : > { %vm1225_vm7 = vcmp.ge.f32.partialorder %v1209_v46, 0.0 }
 0x20d   : > { %1689 = vmatpush1.bf16.msra.mxu0 %v3105_v48  ;;  %v1210_v48 = vadd.f32 %v4003_v36, %v1173_v31  ;;  %vm1222_vm8 = vcmp.ge.f32.partialorder %v1206_v47, 0.0  ;;  %v1238_v34 = vmul.f32 0.01, %v1206_v47  ;;  %vm1231_vm13 = vcmp.ge.f32.partialorder %v1215_v30, 0.0 }
 0x20e   : > { %1742 = vmatpush1.bf16.msra.mxu1 %v3106_v49  ;;  %1690 = vmatprep.subr.bf16.mxu0 %v3107_v50  ;;  %v1145_v49 = vunpack.c.h.bf16 %v3996_v28  ;;  %v3141_v50 = vld [vmem:[#allocation16 + $0xa0] ss:$8 sps:$4 sm:$0xff]   ;;  %v1247_v21 = vmul.f32 0.01, %v1215_v30 }
 0x20f   : > { %1743 = vmatprep.subr.bf16.mxu1 %v3109_v51  ;;  %v3142_v51 = vld [vmem:[#allocation16 + $0x1a0] ss:$8 sps:$4 sm:$0xff]   ;;  %vm1226_vm9 = vcmp.ge.f32.partialorder %v1210_v48, 0.0  ;;  %v1242_v1 = vmul.f32 0.01, %v1210_v48  ;;  %v4021_v25 = vsel %vm1222_vm8, %v1206_v47, %v1238_v34 }
 0x210   : > { %v1182_v12 = vmul.f32 %v3962_v4, %v1145_v49 }
 0x211   : > { %1691 = vmatpush2.bf16.msra.mxu0 %v3111_v53  ;;  %v1239_v53 = vmul.f32 0.01, %v1207_v39 }
 0x212   : > { %1744 = vmatpush2.bf16.msra.mxu1 %v3112_v54  ;;  %1692 = vmatprep.subr.bf16.mxu0 %v3113_v55  ;;  %v1243_v54 = vmul.f32 0.01, %v1211_v40  ;;  %v3143_v55 = vld [vmem:[#allocation16 + $0x94] ss:$8 sps:$4 sm:$0xff]   ;;  %v1219_v31 = vadd.f32 %v3981_v17, %v1182_v12 }
 0x213   : > { %1745 = vmatprep.subr.bf16.mxu1 %v3115_v32  ;;  %v1213_v32 = vadd.f32 %v3993_v27, %v1176_v42 }
 0x214   : > { %vm1235_vm14 = vcmp.ge.f32.partialorder %v1219_v31, 0.0  ;;  %v1251_v42 = vmul.f32 0.01, %v1219_v31 }
 0x215   : > { %1693 = vmatpush2.bf16.msra.mxu0 %v3117_v41  ;;  %v1241_v41 = vmul.f32 0.01, %v1209_v46  ;;  %vm1229_vm10 = vcmp.ge.f32.partialorder %v1213_v32, 0.0 }
 0x216   : > { %1746 = vmatpush2.bf16.msra.mxu1 %v3118_v26  ;;  %1694 = vmatprep.subr.bf16.mxu0 %v3119_v56  ;;  %v3145_v26 = vld [vmem:[#allocation16 + $0x194] ss:$8 sps:$4 sm:$0xff]   ;;  %v1255_v56 = vsel %vm1223_vm5, %v1207_v39, %v1239_v53  ;;  %v1240_v39 = vmul.f32 0.01, %v1208_v22  ;;  %v1267_v47 = vsel %vm1235_vm14, %v1219_v31, %v1251_v42  ;;  %vm1851_vm5 = vcmp.lt.s32.totalorder %v1149_v52, 256 }
 0x217   : > { %1747 = vmatprep.subr.bf16.mxu1 %v3121_v33  ;;  %v1259_v33 = vsel %vm1227_vm6, %v1211_v40, %v1243_v54 }
 0x218   : > { %v1256_v43 = vsel %vm1224_vm11, %v1208_v22, %v1240_v39 }
 0x219   : > { %1695 = vmatpush2.bf16.msra.mxu0 %v3123_v59  ;;  %v1271_v59 = vpack.c.bf16 %v1259_v33, %v1255_v56 }
 0x21a   : > { %1748 = vmatpush2.bf16.msra.mxu1 %v3124_v60  ;;  %1696 = vmatprep.subr.bf16.mxu0 %v3125_v62  ;;  %v1245_v60 = vmul.f32 0.01, %v1213_v32  ;;  %v1257_v62 = vsel %vm1225_vm7, %v1209_v46, %v1241_v41 }
 0x21b   : > { %1749 = vmatprep.subr.bf16.mxu1 %v3127_v63  ;;  %v4015_v63 = vld [vmem:[%s3957_s24 + $0x28] sm:$0xff]  ;;  %1706 = vmatprep.mubr.bf16.mxu0 %v1271_v59 }
 0x21c   : > { %v1261_v9 = vsel %vm1229_vm10, %v1213_v32, %v1245_v60  ;;  %v1143_v18 = vunpack.c.h.bf16 %v4015_v63 }
 0x21d   : > { %1697 = vmatpush2.bf16.msra.mxu0 %v3129_v0  ;;  %v4018_v0 = vld [vmem:[%s3957_s24 + $0x38] sm:$0xff] }
 0x21e   : > { %1750 = vmatpush2.bf16.msra.mxu1 %v3130_v8  ;;  %1698 = vmatprep.subr.bf16.mxu0 %v3131_v15  ;;  %v1175_v8 = vmul.f32 %v3971_v7, %v1138_v20  ;;  %v1273_v15 = vpack.c.bf16 %v1261_v9, %v1257_v62  ;;  %v1147_v19 = vunpack.c.h.bf16 %v4018_v0  ;;  %v3149_v20 = vld [vmem:[#allocation16 + $0x84] ss:$8 sps:$4 sm:$0xff]   ;;  %v1146_v41 = vunpack.c.l.bf16 %v4018_v0 }
 0x21f   : > { %1751 = vmatprep.subr.bf16.mxu1 %v3133_v16  ;;  %v1258_v16 = vsel %vm1226_vm9, %v1210_v48, %v1242_v1 }
 0x220   : > { %v1270_v2 = vpack.c.bf16 %v1258_v16, %v4021_v25  ;;  %v1212_v4 = vadd.f32 %v4028_v10, %v1175_v8  ;;  %1759 = vmatprep.mubr.bf16.mxu1 %v1273_v15  ;;  %v1183_v59 = vmul.f32 %v3971_v7, %v1146_v41 }
 0x221   : > { %1699 = vmatpush2.bf16.msra.mxu0 %v3135_v37  ;;  %v1180_v37 = vmul.f32 %v3964_v5, %v1143_v18 }
 0x222   : > { %1752 = vmatpush2.bf16.msra.mxu1 %v3136_v38  ;;  %1700 = vmatprep.subr.bf16.mxu0 %v3137_v44  ;;  %v1184_v38 = vmul.f32 %v3964_v5, %v1147_v19  ;;  %vm1228_vm12 = vcmp.ge.f32.partialorder %v1212_v4, 0.0  ;;  %v1244_v40 = vmul.f32 0.01, %v1212_v4  ;;  %v1263_v5 = vsel %vm1231_vm13, %v1215_v30, %v1247_v21 }
 0x223   : > { %1753 = vmatprep.subr.bf16.mxu1 %v3139_v45  ;;  %v1217_v17 = vadd.f32 %v3993_v27, %v1180_v37  ;;  %v1144_v45 = vunpack.c.l.bf16 %v3996_v28  ;;  %v1275_v49 = vpack.c.bf16 %v1267_v47, %v1263_v5 }
 0x224   : > { %v1260_v44 = vsel %vm1228_vm12, %v1212_v4, %v1244_v40  ;;  %v1221_v48 = vadd.f32 %v3993_v27, %v1184_v38 }
 0x225   : > { %1701 = vmatpush2.bf16.msra.mxu0 %v3141_v50  ;;  %v1272_v46 = vpack.c.bf16 %v1260_v44, %v1256_v43  ;;  %vm1233_vm15 = vcmp.ge.f32.partialorder %v1217_v17, 0.0  ;;  %v1249_v50 = vmul.f32 0.01, %v1217_v17  ;;  %v1181_v54 = vmul.f32 %v3967_v6, %v1144_v45 }
 0x226   : > { %1754 = vmatpush2.bf16.msra.mxu1 %v3142_v51  ;;  %1702 = vmatprep.subr.bf16.mxu0 %v3143_v55  ;;  %v1177_v51 = vmul.f32 %v3967_v6, %v1140_v23  ;;  %vm1237_vm0 = vcmp.ge.f32.partialorder %v1221_v48, 0.0  ;;  %v1253_v53 = vmul.f32 0.01, %v1221_v48  ;;  %v1142_v55 = vunpack.c.l.bf16 %v4015_v63 }
 0x227   : > { %1755 = vmatprep.subr.bf16.mxu1 %v3145_v26  ;;  %v1265_v32 = vsel %vm1233_vm15, %v1217_v17, %v1249_v50  ;;  %v1218_v27 = vadd.f32 %v4003_v36, %v1181_v54  ;;  %v1220_v63 = vadd.f32 %v4028_v10, %v1183_v59 }
 0x228   : > { %v1214_v28 = vadd.f32 %v4003_v36, %v1177_v51  ;;  %v1269_v26 = vsel %vm1237_vm0, %v1221_v48, %v1253_v53  ;;  %v1179_v56 = vmul.f32 %v3971_v7, %v1142_v55  ;;  %v1342_v7 = vld [vmem:[%s4265_s4] sm:$0x3] }
 0x229   : > { %1703 = vmatpush2.bf16.msra.mxu0 %v3147_v13  ;;  %v1277_v33 = vpack.c.bf16 %v1269_v26, %v1265_v32  ;;  %vm1234_vm2 = vcmp.ge.f32.partialorder %v1218_v27, 0.0  ;;  %v1250_v6 = vmul.f32 0.01, %v1218_v27  ;;  %vm1236_vm4 = vcmp.ge.f32.partialorder %v1220_v63, 0.0 }
 0x22a   : > { %1756 = vmatpush2.bf16.msra.mxu1 %v3148_v14  ;;  %1704 = vmatprep.subr.bf16.mxu0 %v3149_v20  ;;  %vm1230_vm1 = vcmp.ge.f32.partialorder %v1214_v28, 0.0  ;;  %v1246_v34 = vmul.f32 0.01, %v1214_v28  ;;  %v1216_v60 = vadd.f32 %v4028_v10, %v1179_v56  ;;  %v1252_v25 = vmul.f32 0.01, %v1220_v63 }
 0x22b   : > { %1757 = vmatprep.subr.bf16.mxu1 %v3151_v35  ;;  %v1266_v0 = vsel %vm1234_vm2, %v1218_v27, %v1250_v6  ;;  %v1347_v11 = vrot.slane %v1342_v7, %v3952_v61  ;;  %v1351_v12 = vrot.slane %v1342_v7, %v3948_v58 }
 0x22c   : > { %v1262_v62 = vsel %vm1230_vm1, %v1214_v28, %v1246_v34  ;;  %vm1232_vm3 = vcmp.ge.f32.partialorder %v1216_v60, 0.0  ;;  %v1248_v36 = vmul.f32 0.01, %v1216_v60  ;;  %v1268_v8 = vsel %vm1236_vm4, %v1220_v63, %v1252_v25 }
 0x22d   : > { %1705 = vmatpush2.bf16.msra.mxu0 %v3153_v24  ;;  %v1274_v1 = vpack.c.bf16 %v1266_v0, %v1262_v62 }
 0x22e   : > { %1758 = vmatpush2.bf16.msra.mxu1 %v3154_v29  ;;  %v1264_v3 = vsel %vm1232_vm3, %v1216_v60, %v1248_v36 }
 0x22f   : > { %v1276_v9 = vpack.c.bf16 %v1268_v8, %v1264_v3 }
 0x230   : > { %1707 = vmatmul.mubr.bf16.vlgmr.msra.gmra.mxu0 %v1270_v2 }
 0x231   : > { %1760 = vmatmul.mubr.bf16.vlgmr.msra.gmra.mxu1 %v1272_v46  ;;  %1716 = vmatprep.mubr.bf16.mxu0 %v1275_v49 }
 0x232   : > { %1769 = vmatprep.mubr.bf16.mxu1 %v1277_v33 }
 0x238   : > { %1717 = vmatmul.mubr.bf16.gmra.mxu0 %v1274_v1 }
 0x239   : > { %1770 = vmatmul.mubr.bf16.gmra.mxu1 %v1276_v9 }
 0x2f0   : > { %v1708_v10 = vpop.f32.mrf.mxu0 }
 0x2f1   : > { %v1761_v13 = vpop.f32.mrf.mxu1  ;;  %v1709_v14 = vadd.f32 %v1708_v10, %v1347_v11 }
 0x2f2   : > { %v1710_v15 = vpop.f32.mrf.mxu0 }
 0x2f3   : > { %v1763_v16 = vpop.f32.mrf.mxu1  ;;  %v1711_v18 = vadd.f32 %v1710_v15, %v1351_v12  ;;  %v1762_v35 = vadd.f32 %v1761_v13, %v1709_v14  ;;  %v3561_v13 = vmov 1966171168  }
 0x2f4   : > { %v1712_v19 = vpop.f32.mrf.mxu0  ;;  %v1834_v14 = vunpack.c.l.s4 %v3561_v13 }
 0x2f5   : > { %v1765_v20 = vpop.f32.mrf.mxu1  ;;  %v1764_v2 = vadd.f32 %v1763_v16, %v1711_v18  ;;  %v1713_v22 = vadd.f32 %v1712_v19, %v1347_v11  ;;  %v1855_v42 = vmul.f32 %v1762_v35, %v1762_v35 }
 0x2f6   : > { %v1714_v4 = vpop.f32.mrf.mxu0 }
 0x2f7   : > { %v1767_v23 = vpop.f32.mrf.mxu1  ;;  %v2787_v24 = vpack.c.bf16 %v1764_v2, %v1762_v35  ;;  %v1766_v29 = vadd.f32 %v1765_v20, %v1713_v22  ;;  %v1715_v30 = vadd.f32 %v1714_v4, %v1351_v12  ;;  %v1856_v28 = vmul.f32 %v1764_v2, %v1764_v2 }
 0x2f8   : > { %v1718_v61 = vpop.f32.mrf.mxu0  ;;  %v1835_v4 = vunpack.c.0.s8 %v1834_v14 }
 0x2f9   : > { %1807 = vst [vmem:[%s4062_s25] sm:$0xff] %v2787_v24  ;;  %v1768_v58 = vadd.f32 %v1767_v23, %v1715_v30  ;;  %v1719_v31 = vadd.f32 %v1718_v61, %v1347_v11  ;;  %v1771_v37 = vpop.f32.mrf.mxu1  ;;  %v1857_v38 = vmul.f32 %v1766_v29, %v1766_v29  ;;  %v1812_v45 = vadd.f32 %v1766_v29, %v1762_v35 }
 0x2fa   : > { %v1720_v39 = vpop.f32.mrf.mxu0 }
 0x2fb   : > { %v2788_v40 = vpack.c.bf16 %v1768_v58, %v1766_v29  ;;  %v1773_v21 = vpop.f32.mrf.mxu1  ;;  %v1772_v43 = vadd.f32 %v1771_v37, %v1719_v31  ;;  %v1721_v44 = vadd.f32 %v1720_v39, %v1351_v12  ;;  %v1863_v47 = vadd.f32 %v1857_v38, %v1855_v42  ;;  %v1811_v42 = vld [vmem:[#allocation6] sm:$0x3] }
 0x2fc   : > { %v1722_v17 = vpop.f32.mrf.mxu0  ;;  %v1858_v48 = vmul.f32 %v1768_v58, %v1768_v58  ;;  %v1821_v53 = vadd.f32 %v1768_v58, %v1764_v2  ;;  %v1838_v31 = vsub.s32 %v1835_v4, %v3945_v57 }
 0x2fd   : > { %1808 = vst [vmem:[%s4062_s25 + $0x8] sm:$0xff] %v2788_v40  ;;  %v1723_v46 = vadd.f32 %v1722_v17, %v1347_v11  ;;  %v1775_v5 = vpop.f32.mrf.mxu1  ;;  %v1859_v49 = vmul.f32 %v1772_v43, %v1772_v43  ;;  %v1774_v50 = vadd.f32 %v1773_v21, %v1721_v44  ;;  %v1813_v54 = vadd.f32 %v1812_v45, %v1772_v43 }
 0x2fe   : > { %v1724_v51 = vpop.f32.mrf.mxu0  ;;  %v1872_v60 = vadd.f32 %v1858_v48, %v1856_v28 }
 0x2ff   : > { %v1776_v55 = vadd.f32 %v1775_v5, %v1723_v46  ;;  %v1725_v32 = vadd.f32 %v1724_v51, %v1351_v12  ;;  %v1864_v41 = vadd.f32 %v1863_v47, %v1859_v49  ;;  %v2789_v26 = vpack.c.bf16 %v1774_v50, %v1772_v43  ;;  %v1777_v56 = vpop.f32.mrf.mxu1  ;;  %v1854_v46 = vld [vmem:[#allocation7] sm:$0x3] }
 0x300   : > { %v1860_v27 = vmul.f32 %v1774_v50, %v1774_v50  ;;  %v1822_v33 = vadd.f32 %v1821_v53, %v1774_v50 }
 0x301   : > { %v1814_v34 = vadd.f32 %v1813_v54, %v1776_v55  ;;  %v1861_v59 = vmul.f32 %v1776_v55, %v1776_v55  ;;  %v1778_v6 = vadd.f32 %v1777_v56, %v1725_v32  ;;  %1809 = vst [vmem:[%s4062_s25 + $0x10] sm:$0xff] %v2789_v26 }
 0x302   : > { %v1873_v1 = vadd.f32 %v1872_v60, %v1860_v27 }
 0x303   : > { %v1815_v62 = vrot.slane %v1814_v34, 4  ;;  %v1865_v63 = vadd.f32 %v1864_v41, %v1861_v59  ;;  %v2790_v0 = vpack.c.bf16 %v1778_v6, %v1776_v55  ;;  %v1823_v36 = vadd.f32 %v1822_v33, %v1778_v6 }
 0x304   : > { %v1862_v25 = vmul.f32 %v1778_v6, %v1778_v6 }
 0x305   : > { %v1816_v3 = vadd.f32 %v1815_v62, %v1814_v34  ;;  %v1866_v8 = vrot.slane %v1865_v63, 4  ;;  %1810 = vst [vmem:[%s4062_s25 + $0x18] sm:$0xff] %v2790_v0  ;;  %v1824_v9 = vrot.slane %v1823_v36, 4 }
 0x306   : > { %v1874_v7 = vadd.f32 %v1873_v1, %v1862_v25 }
 0x307   : > { %v1817_v11 = vrot.slane %v1816_v3, 2  ;;  %v1867_v12 = vadd.f32 %v1866_v8, %v1865_v63  ;;  %v1825_v10 = vadd.f32 %v1824_v9, %v1823_v36 }
 0x308   : > { %v1875_v15 = vrot.slane %v1874_v7, 4 }
 0x309   : > { %v1818_v16 = vadd.f32 %v1817_v11, %v1816_v3  ;;  %v1868_v18 = vrot.slane %v1867_v12, 2  ;;  %v1826_v19 = vrot.slane %v1825_v10, 2 }
 0x30a   : > { %v1876_v20 = vadd.f32 %v1875_v15, %v1874_v7 }
 0x30b   : > { %v1819_v35 = vrot.slane %v1818_v16, 1  ;;  %v1869_v2 = vadd.f32 %v1868_v18, %v1867_v12  ;;  %v1827_v22 = vadd.f32 %v1826_v19, %v1825_v10 }
 0x30c   : > { %v1877_v23 = vrot.slane %v1876_v20, 2 }
 0x30d   : > { %v1828_v24 = vrot.slane %v1827_v22, 1  ;;  %v1870_v29 = vrot.slane %v1869_v2, 1  ;;  %v1820_v61 = vadd.f32 %v1819_v35, %v1818_v16 }
 0x30e   : > { %v1878_v30 = vadd.f32 %v1877_v23, %v1876_v20 }
 0x30f   : > { %v1829_v58 = vadd.f32 %v1828_v24, %v1827_v22  ;;  %v1871_v39 = vadd.f32 %v1870_v29, %v1869_v2 }
 0x310   : > { %v1879_v37 = vrot.slane %v1878_v30, 1 }
 0x311   : > { %v1832_v38 = vcombine.low %v1820_v61, %v1829_v58 }
 0x312   : > { %v1880_v40 = vadd.f32 %v1879_v37, %v1878_v30 }
 0x313   : > { %v1839_v21 = vrot.slane %v1832_v38, %v1838_v31 }
 0x314   : > { %v1883_v43 = vcombine.low %v1871_v39, %v1880_v40 }
 0x315   : > { %v1846_v44 = vrot.slane %v1839_v21, %v1838_v31 }
 0x316   : > { %v1890_v17 = vrot.slane %v1883_v43, %v1838_v31 }
 0x317   : > { %v1848_v45 = vadd.f32 %v1846_v44, %v1811_v42 }
 0x318   : > { %v1897_v5 = vrot.slane %v1890_v17, %v1838_v31 }
 0x319   : > { %1853 = vst.msk [vmem:[#allocation6] sm:$0x3] %vm1851_vm5, %v1848_v45 }
 0x31a   : > { %v1899_v47 = vadd.f32 %v1897_v5, %v1854_v46 }
 0x31c   : > { %1900 = vst.msk [vmem:[#allocation7] sm:$0x3] %vm1851_vm5, %v1899_v47 }
 0x31d PF: > { %s4266_s8 = sld [smem:[#allocation29_spill]] }
 0x323   : > { %p2738_p11 = scmp.ne.s32.totalorder %s4266_s8, 2 }
 0x324   : > { %p2739_p12 = scmp.ne.s32.totalorder (!%p2738_p11), %s3527_s19, 0 }
 0x325   : > { %1904 = sbr.rel (%p2738_p11) target bundleno = 1460 (0x5b4), region = 120 }
 0x32a   : > { %1908 = sbr.rel (%p2739_p12) target bundleno = 847 (0x34f), region = 124  ;;  %s4267_s5 = sld [smem:[#allocation38_spill]] (!%p2739_p12) }
 0x32b   : > { %s4268_s3 = sld [smem:[#allocation39_spill]] (!%p2739_p12) }
 0x32f   : > { %v1909_v57 = vld [vmem:[#allocation6] sm:$0x3]  ;;  %v1910_v48 = vld [vmem:[#allocation7] sm:$0x3]  ;;  %v1923_v55 = vlaneseq }
 0x330   : > { %v1913_v49 = vmul.f32 0.015625, %v1909_v57  ;;  %v1914_v50 = vmul.f32 0.015625, %v1910_v48  ;;  %v1911_v32 = vld [vmem:[%s4267_s5] sm:$0x3] }
 0x331   : > { %vm1925_vm6 = vcmp.lt.s32.totalorder %v1923_v55, 256  ;;  %v1912_v26 = vld [vmem:[%s4268_s3] sm:$0x3] }
 0x332   : > { %v1915_v51 = vmul.f32 %v1913_v49, %v1913_v49 }
 0x334   : > { %v1916_v52 = vsub.f32 %v1914_v50, %v1915_v51 }
 0x336   : > { %v1917_v53 = vmax.f32 %v1916_v52, 0.0 }
 0x338   : > { %v1918_v54 = vadd.f32 1e-05, %v1917_v53 }
 0x33a   : > { %3155 = vrsqrt.f32 %v1918_v54 }
 0x347   : > { %v3156_v28 = vpop.eup %3155 }
 0x348   : > { %v1920_v41 = vmul.f32 %v3156_v28, %v1911_v32 }
 0x34a   : > { %v1921_v27 = vmul.f32 %v1920_v41, %v1913_v49  ;;  %1927 = vst.msk [vmem:[#allocation6] sm:$0x3] %vm1925_vm6, %v1920_v41 }
 0x34c   : > { %v1922_v56 = vsub.f32 %v1912_v26, %v1921_v27 }
 0x34e   : > { %1928 = vst.msk [vmem:[#allocation7] sm:$0x3] %vm1925_vm6, %v1922_v56 }
 0x34f PF: > { %v3157_v33 = vld [vmem:[#allocation17 + $0x78] sm:$0xff]   ;;  %v3159_v59 = vld [vmem:[#allocation17 + $0x70] sm:$0xff]   ;;  %v3161_v60 = vld [vmem:[#allocation17 + $0x68] sm:$0xff]   ;;  %v1949_v62 = vlaneseq  ;;  %s1935_s27 = scalar_lea.vmem [#allocation3], %s3876_s14  ;;  %s4269_s20 = sld [smem:[#allocation41_spill]] }
 0x350   : > { %v3158_v34 = vld [vmem:[#allocation17 + $0x38] sm:$0xff]   ;;  %2795 = vmatprep.subr.bf16.mxu0 %v3157_v33  ;;  %v3160_v6 = vld [vmem:[#allocation17 + $0x30] sm:$0xff]   ;;  %v3162_v63 = vld [vmem:[#allocation17 + $0x28] sm:$0xff]   ;;  %s4270_s25 = sld [smem:[#allocation43_spill]] }
 0x351   : > { %2796 = vmatpush3.bf16.msra.mxu0 %v3158_v34  ;;  %v3163_v0 = vld [vmem:[#allocation17 + $0x60] sm:$0xff]   ;;  %v1950_v36 = vshrl.u32 %v1949_v62, 7  ;;  %v3165_v25 = vld [vmem:[#allocation17 + $0x58] sm:$0xff]   ;;  %v3167_v7 = vld [vmem:[#allocation17 + $0x50] sm:$0xff]  }
 0x352   : > { %2797 = vmatprep.subr.bf16.mxu0 %v3159_v59  ;;  %v3164_v1 = vld [vmem:[#allocation17 + $0x20] sm:$0xff]   ;;  %v3166_v9 = vld [vmem:[#allocation17 + $0x18] sm:$0xff]   ;;  %v1929_v11 = vld [vmem:[#allocation6] sm:$0x3] }
 0x353   : > { %v1951_v3 = vsub.s32 0, %v1950_v36  ;;  %v1955_v8 = vsub.s32 1, %v1950_v36  ;;  %v1936_v10 = vld [vmem:[%s1935_s27] sm:$0xff]  ;;  %v1937_v14 = vld [vmem:[%s1935_s27 + $0x8] sm:$0xff]  ;;  %v1938_v20 = vld [vmem:[%s1935_s27 + $0x10] sm:$0xff] }
 0x354   : > { %v3168_v13 = vld [vmem:[#allocation17 + $0x10] sm:$0xff]   ;;  %v1940_v15 = vunpack.c.l.bf16 %v1936_v10  ;;  %v1941_v16 = vunpack.c.h.bf16 %v1936_v10  ;;  %v1939_v35 = vld [vmem:[%s1935_s27 + $0x18] sm:$0xff]  ;;  %v1942_v22 = vunpack.c.l.bf16 %v1937_v14  ;;  %v1943_v4 = vunpack.c.h.bf16 %v1937_v14  ;;  %v3173_v29 = vld [vmem:[#allocation19 + $0x38] sm:$0xff]  }
 0x355   : > { %2798 = vmatpush3.bf16.msra.mxu0 %v3160_v6  ;;  %v1930_v12 = vld [vmem:[#allocation7] sm:$0x3]  ;;  %v1952_v18 = vrot.slane %v1929_v11, %v1951_v3  ;;  %v1956_v19 = vrot.slane %v1929_v11, %v1955_v8  ;;  %v3169_v2 = vld [vmem:[#allocation17 + $0x48] sm:$0xff]   ;;  %v1945_v58 = vunpack.c.h.bf16 %v1938_v20  ;;  %v1947_v31 = vunpack.c.h.bf16 %v1939_v35  ;;  %2833 = vmatprep.subr.bf16.mxu1 %v3173_v29  ;;  %v3171_v46 = vld [vmem:[#allocation17 + $0x40] sm:$0xff]  }
 0x356   : > { %2799 = vmatprep.subr.bf16.mxu0 %v3161_v60  ;;  %v1971_v23 = vrot.slane %v1930_v12, %v1951_v3  ;;  %v1975_v24 = vrot.slane %v1930_v12, %v1955_v8  ;;  %v3174_v37 = vld [vmem:[#allocation19 + $0x30] sm:$0xff]   ;;  %v1944_v40 = vunpack.c.l.bf16 %v1938_v20  ;;  %v1946_v21 = vunpack.c.l.bf16 %v1939_v35  ;;  %v3170_v42 = vld [vmem:[#allocation17 + $0x8] sm:$0xff]   ;;  %2834 = vmatpush3.bf16.msra.mxu1 %v3173_v29  ;;  %v3172_v27 = vld [vmem:[#allocation17] sm:$0xff]  }
 0x357   : > { %v1960_v30 = vmul.f32 %v1956_v19, %v1941_v16  ;;  %v1959_v61 = vmul.f32 %v1952_v18, %v1940_v15  ;;  %v1962_v38 = vmul.f32 %v1956_v19, %v1943_v4  ;;  %v1961_v39 = vmul.f32 %v1952_v18, %v1942_v22  ;;  %2835 = vmatprep.subr.bf16.mxu1 %v3174_v37  ;;  %v3175_v8 = vld [vmem:[#allocation19 + $0x28] sm:$0xff]   ;;  %v3178_v11 = vld [vmem:[#allocation19 + $0x10] sm:$0xff]   ;;  %v3180_v10 = vld [vmem:[#allocation19] sm:$0xff]  }
 0x358   : > { %v1964_v17 = vmul.f32 %v1956_v19, %v1945_v58  ;;  %v1966_v45 = vmul.f32 %v1956_v19, %v1947_v31  ;;  %v1963_v57 = vmul.f32 %v1952_v18, %v1944_v40  ;;  %v1965_v48 = vmul.f32 %v1952_v18, %v1946_v21  ;;  %v3179_v12 = vld [vmem:[#allocation19 + $0x8] sm:$0xff]  }
 0x359   : > { %2800 = vmatpush3.bf16.msra.mxu0 %v3162_v63  ;;  %v1979_v43 = vadd.f32 %v1975_v24, %v1960_v30  ;;  %v1978_v44 = vadd.f32 %v1971_v23, %v1959_v61  ;;  %v1981_v5 = vadd.f32 %v1975_v24, %v1962_v38  ;;  %v1980_v47 = vadd.f32 %v1971_v23, %v1961_v39  ;;  %v2742_v14 = vld [vmem:[%s4269_s20] ss:$0 sm:$0xff] }
 0x35a   : > { %2801 = vmatprep.subr.bf16.mxu0 %v3163_v0  ;;  %v1983_v54 = vadd.f32 %v1975_v24, %v1964_v17  ;;  %v1985_v55 = vadd.f32 %v1975_v24, %v1966_v45  ;;  %2836 = vmatpush3.bf16.msra.mxu1 %v3174_v37  ;;  %v1982_v26 = vadd.f32 %v1971_v23, %v1963_v57 }
 0x35b   : > { %vm1987_vm7 = vcmp.ge.f32.partialorder %v1979_v43, 0.0  ;;  %v1995_v49 = vmul.f32 0.01, %v1979_v43  ;;  %vm1986_vm8 = vcmp.ge.f32.partialorder %v1978_v44, 0.0  ;;  %v1994_v50 = vmul.f32 0.01, %v1978_v44  ;;  %2837 = vmatprep.subr.bf16.mxu1 %v3175_v8 }
 0x35c   : > { %vm1989_vm9 = vcmp.ge.f32.partialorder %v1981_v5, 0.0  ;;  %v1997_v51 = vmul.f32 0.01, %v1981_v5  ;;  %vm1988_vm10 = vcmp.ge.f32.partialorder %v1980_v47, 0.0  ;;  %v1996_v52 = vmul.f32 0.01, %v1980_v47 }
 0x35d   : > { %2802 = vmatpush3.bf16.msra.mxu0 %v3164_v1  ;;  %v2003_v53 = vsel %vm1987_vm7, %v1979_v43, %v1995_v49  ;;  %v2002_v28 = vsel %vm1986_vm8, %v1978_v44, %v1994_v50  ;;  %vm1991_vm11 = vcmp.ge.f32.partialorder %v1983_v54, 0.0  ;;  %vm1993_vm12 = vcmp.ge.f32.partialorder %v1985_v55, 0.0 }
 0x35e   : > { %2803 = vmatprep.subr.bf16.mxu0 %v3165_v25  ;;  %v2005_v32 = vsel %vm1989_vm9, %v1981_v5, %v1997_v51  ;;  %v2004_v41 = vsel %vm1988_vm10, %v1980_v47, %v1996_v52  ;;  %v1984_v33 = vadd.f32 %v1971_v23, %v1965_v48  ;;  %v1999_v34 = vmul.f32 0.01, %v1983_v54  ;;  %2838 = vmatpush3.bf16.msra.mxu1 %v3175_v8 }
 0x35f   : > { %v2011_v56 = vpack.c.bf16 %v2005_v32, %v2003_v53  ;;  %v2001_v59 = vmul.f32 0.01, %v1985_v55  ;;  %v2010_v6 = vpack.c.bf16 %v2004_v41, %v2002_v28  ;;  %v1998_v0 = vmul.f32 0.01, %v1982_v26 }
 0x360   : > { %v2007_v60 = vsel %vm1991_vm11, %v1983_v54, %v1999_v34  ;;  %v2000_v36 = vmul.f32 0.01, %v1984_v33  ;;  %vm1990_vm13 = vcmp.ge.f32.partialorder %v1982_v26, 0.0  ;;  %vm1992_vm14 = vcmp.ge.f32.partialorder %v1984_v33, 0.0 }
 0x361   : > { %2804 = vmatpush3.bf16.msra.mxu0 %v3166_v9  ;;  %2181 = vmatprep.mubr.bf16.mxu0 %v2011_v56  ;;  %v2009_v62 = vsel %vm1993_vm12, %v1985_v55, %v2001_v59  ;;  %v2006_v1 = vsel %vm1990_vm13, %v1982_v26, %v1998_v0  ;;  %v3176_v9 = vld [vmem:[#allocation19 + $0x20] sm:$0xff]   ;;  %v2759_v59 = vld [vmem:[%s4270_s25] ss:$0 sm:$0xff] }
 0x362   : > { %2805 = vmatprep.subr.bf16.mxu0 %v3167_v7  ;;  %v2013_v63 = vpack.c.bf16 %v2009_v62, %v2007_v60  ;;  %v2008_v25 = vsel %vm1992_vm14, %v1984_v33, %v2000_v36  ;;  %2839 = vmatprep.subr.bf16.mxu1 %v3176_v9  ;;  %v3177_v7 = vld [vmem:[#allocation19 + $0x18] sm:$0xff]  }
 0x363   : > { %v2012_v3 = vpack.c.bf16 %v2008_v25, %v2006_v1  ;;  %2840 = vmatpush3.bf16.msra.mxu1 %v3176_v9 }
 0x364   : > { %2841 = vmatprep.subr.bf16.mxu1 %v3177_v7 }
 0x365   : > { %2806 = vmatpush3.bf16.msra.mxu0 %v3168_v13 }
 0x366   : > { %2807 = vmatprep.subr.bf16.mxu0 %v3169_v2 }
 0x367   : > { %2842 = vmatpush3.bf16.msra.mxu1 %v3177_v7 }
 0x368   : > { %2843 = vmatprep.subr.bf16.mxu1 %v3178_v11 }
 0x369   : > { %2808 = vmatpush3.bf16.msra.mxu0 %v3170_v42 }
 0x36a   : > { %2809 = vmatprep.subr.bf16.mxu0 %v3171_v46 }
 0x36b   : > { %2844 = vmatpush3.bf16.msra.mxu1 %v3178_v11 }
 0x36c   : > { %2845 = vmatprep.subr.bf16.mxu1 %v3179_v12 }
 0x36d   : > { %2810 = vmatpush3.bf16.msra.mxu0 %v3172_v27 }
 0x36f   : > { %2846 = vmatpush3.bf16.msra.mxu1 %v3179_v12 }
 0x370   : > { %2182 = vmatmul.mubr.bf16.vlgmr.msra.gmra.mxu0 %v2010_v6  ;;  %2847 = vmatprep.subr.bf16.mxu1 %v3180_v10 }
 0x371   : > { %2189 = vmatprep.mubr.bf16.mxu0 %v2013_v63 }
 0x373   : > { %2848 = vmatpush3.bf16.msra.mxu1 %v3180_v10 }
 0x378   : > { %2190 = vmatmul.mubr.bf16.gmra.mxu0 %v2012_v3 }
 0x430   : > { %v2811_v13 = vpop.f32.mrf.mxu0 }
 0x432   : > { %v2812_v15 = vpop.f32.mrf.mxu0 }
 0x433   : > { %v2813_v16 = vadd.f32 %v2812_v15, %v2811_v13 }
 0x434   : > { %v2814_v18 = vpop.f32.mrf.mxu0 }
 0x435   : > { %v2184_v19 = vadd.f32 %v2813_v16, %v2742_v14 }
 0x436   : > { %v2815_v20 = vpop.f32.mrf.mxu0 }
 0x437   : > { %v2816_v35 = vadd.f32 %v2815_v20, %v2814_v18  ;;  %v2332_v2 = vmul.f32 %v2184_v19, %v2184_v19  ;;  %v2202_v23 = vmul.f32 0.01, %v2184_v19  ;;  %vm2198_vm15 = vcmp.ge.f32.partialorder %v2184_v19, 0.0 }
 0x438   : > { %v2817_v22 = vpop.f32.mrf.mxu0 }
 0x439   : > { %v2187_v4 = vadd.f32 %v2816_v35, %v2742_v14  ;;  %2336 = vadd.xlane.f32.xlu0 %v2332_v2  ;;  %v2206_v37 = vsel %vm2198_vm15, %v2184_v19, %v2202_v23 }
 0x43a   : > { %v2818_v24 = vpop.f32.mrf.mxu0 }
 0x43b   : > { %v2819_v29 = vadd.f32 %v2818_v24, %v2817_v22  ;;  %v2333_v30 = vmul.f32 %v2187_v4, %v2187_v4  ;;  %vm2199_vm0 = vcmp.ge.f32.partialorder %v2187_v4, 0.0  ;;  %v2203_v61 = vmul.f32 0.01, %v2187_v4 }
 0x43c   : > { %v2820_v58 = vpop.f32.mrf.mxu0 }
 0x43d   : > { %v2192_v31 = vadd.f32 %v2819_v29, %v2742_v14  ;;  %2338 = vadd.xlane.f32.xlu0 %v2333_v30  ;;  %v2207_v38 = vsel %vm2199_vm0, %v2187_v4, %v2203_v61 }
 0x43e   : > { %v2821_v39 = vpop.f32.mrf.mxu0  ;;  %v2210_v40 = vpack.c.bf16 %v2207_v38, %v2206_v37 }
 0x43f   : > { %v2822_v21 = vadd.f32 %v2821_v39, %v2820_v58  ;;  %v2334_v42 = vmul.f32 %v2192_v31, %v2192_v31  ;;  %v2204_v44 = vmul.f32 0.01, %v2192_v31  ;;  %vm2200_vm1 = vcmp.ge.f32.partialorder %v2192_v31, 0.0 }
 0x440   : > { %2849 = vmatprep.mubr.bf16.mxu1 %v2210_v40 }
 0x441   : > { %v2195_v43 = vadd.f32 %v2822_v21, %v2742_v14  ;;  %2340 = vadd.xlane.f32.xlu1 %v2334_v42  ;;  %v2208_v46 = vsel %vm2200_vm1, %v2192_v31, %v2204_v44 }
 0x443   : > { %v2335_v17 = vmul.f32 %v2195_v43, %v2195_v43  ;;  %vm2201_vm2 = vcmp.ge.f32.partialorder %v2195_v43, 0.0  ;;  %v2205_v45 = vmul.f32 0.01, %v2195_v43 }
 0x445   : > { %2342 = vadd.xlane.f32.xlu1 %v2335_v17  ;;  %v2209_v5 = vsel %vm2201_vm2, %v2195_v43, %v2205_v45 }
 0x446   : > { %v2211_v47 = vpack.c.bf16 %v2209_v5, %v2208_v46 }
 0x448   : > { %2850 = vmatmul.mubr.bf16.vlgmr.msra.gmra.mxu1 %v2211_v47 }
 0x4c2   : > { %v2337_v57 = vpop.xlane.xlu0 %2336 }
 0x4c3   : > { %v2344_v48 = vmax.f32 %v2337_v57, 1e-24 }
 0x4c5   : > { %3181 = vrsqrt.f32 %v2344_v48 }
 0x4c6   : > { %v2339_v49 = vpop.xlane.xlu0 %2338 }
 0x4c7   : > { %v2345_v50 = vmax.f32 %v2339_v49, 1e-24 }
 0x4c9   : > { %3183 = vrsqrt.f32 %v2345_v50 }
 0x4ca   : > { %v2341_v51 = vpop.xlane.xlu1 %2340 }
 0x4cb   : > { %v2346_v52 = vmax.f32 %v2341_v51, 1e-24 }
 0x4cd   : > { %3185 = vrsqrt.f32 %v2346_v52 }
 0x4ce   : > { %v2343_v53 = vpop.xlane.xlu1 %2342 }
 0x4cf   : > { %v2347_v54 = vmax.f32 %v2343_v53, 1e-24 }
 0x4d1   : > { %3187 = vrsqrt.f32 %v2347_v54 }
 0x4d2   : > { %v3182_v55 = vpop.eup %3181 }
 0x4d3   : > { %v2352_v32 = vmul.f32 %v3182_v55, %v2184_v19 }
 0x4d5   : > { %2356 = vst [vmem:[%s3879_s7] sm:$0xff] %v2352_v32 }
 0x4d6   : > { %v3184_v28 = vpop.eup %3183 }
 0x4d7   : > { %v2353_v41 = vmul.f32 %v3184_v28, %v2187_v4 }
 0x4d9   : > { %2357 = vst [vmem:[%s3879_s7 + $0x8] sm:$0xff] %v2353_v41 }
 0x4da   : > { %v3186_v26 = vpop.eup %3185 }
 0x4db   : > { %v2354_v27 = vmul.f32 %v3186_v26, %v2192_v31 }
 0x4dd   : > { %2358 = vst [vmem:[%s3879_s7 + $0x10] sm:$0xff] %v2354_v27 }
 0x4de   : > { %v3188_v56 = vpop.eup %3187 }
 0x4df   : > { %v2355_v33 = vmul.f32 %v3188_v56, %v2195_v43 }
 0x4e1   : > { %2359 = vst [vmem:[%s3879_s7 + $0x18] sm:$0xff] %v2355_v33 }
 0x508   : > { %v2851_v34 = vpop.f32.mrf.mxu1 }
 0x509   : > { %v2326_v63 = vadd.f32 %v2851_v34, %v2759_v59 }
 0x50a   : > { %v2317_v6 = vpop.f32.mrf.mxu1 }
 0x50b   : > { %v2318_v60 = vadd.f32 %v2759_v59, %v2317_v6  ;;  %v2362_v8 = vmul.f32 %v2326_v63, %v2326_v63 }
 0x50c   : > { %v2852_v62 = vpop.f32.mrf.mxu1 }
 0x50d   : > { %v2360_v0 = vmul.f32 %v2318_v60, %v2318_v60  ;;  %v2329_v25 = vadd.f32 %v2852_v62, %v2759_v59 }
 0x50e   : > { %v2320_v36 = vpop.f32.mrf.mxu1 }
 0x50f   : > { %v2321_v1 = vadd.f32 %v2759_v59, %v2320_v36  ;;  %2364 = vadd.xlane.f32.xlu0 %v2360_v0  ;;  %v2363_v9 = vmul.f32 %v2329_v25, %v2329_v25 }
 0x511   : > { %v2361_v3 = vmul.f32 %v2321_v1, %v2321_v1 }
 0x513   : > { %2366 = vadd.xlane.f32.xlu1 %v2361_v3  ;;  %2368 = vadd.xlane.f32.xlu0 %v2362_v8 }
 0x517   : > { %2370 = vadd.xlane.f32.xlu1 %v2363_v9 }
 0x598   : > { %v2365_v7 = vpop.xlane.xlu0 %2364 }
 0x599   : > { %v2372_v11 = vmax.f32 %v2365_v7, 1e-24 }
 0x59b   : > { %3189 = vrsqrt.f32 %v2372_v11 }
 0x59c   : > { %v2367_v12 = vpop.xlane.xlu1 %2366  ;;  %v2369_v10 = vpop.xlane.xlu0 %2368 }
 0x59d   : > { %v2373_v13 = vmax.f32 %v2367_v12, 1e-24  ;;  %v2374_v14 = vmax.f32 %v2369_v10, 1e-24 }
 0x59f   : > { %3191 = vrsqrt.f32 %v2373_v13 }
 0x5a0   : > { %3193 = vrsqrt.f32 %v2374_v14  ;;  %v2371_v15 = vpop.xlane.xlu1 %2370 }
 0x5a1   : > { %v2375_v16 = vmax.f32 %v2371_v15, 1e-24 }
 0x5a3   : > { %3195 = vrsqrt.f32 %v2375_v16 }
 0x5a8   : > { %v3190_v18 = vpop.eup %3189 }
 0x5a9   : > { %v2380_v19 = vmul.f32 %v3190_v18, %v2318_v60 }
 0x5ab   : > { %2384 = vst [vmem:[%s3881_s13] sm:$0xff] %v2380_v19 }
 0x5ac   : > { %v3192_v20 = vpop.eup %3191 }
 0x5ad   : > { %v3194_v35 = vpop.eup %3193  ;;  %v2381_v2 = vmul.f32 %v3192_v20, %v2321_v1 }
 0x5ae   : > { %v2382_v22 = vmul.f32 %v3194_v35, %v2326_v63 }
 0x5af   : > { %2385 = vst [vmem:[%s3881_s13 + $0x8] sm:$0xff] %v2381_v2 }
 0x5b0   : > { %v3196_v4 = vpop.eup %3195  ;;  %2386 = vst [vmem:[%s3881_s13 + $0x10] sm:$0xff] %v2382_v22 }
 0x5b1   : > { %v2383_v23 = vmul.f32 %v3196_v4, %v2329_v25 }
 0x5b3   : > { %2387 = vst [vmem:[%s3881_s13 + $0x18] sm:$0xff] %v2383_v23 }
 0x5b4 PF: > { %s4271_s8 = sld [smem:[#allocation29_spill]]  ;;  %s2409_s16 = sshll.u32 %s3879_s7, 4  ;;  %s4096_s16 = int_to_ptr.vmem [resolvable:$true] %s2409_s16 }
 0x5b5   : > { %s4272_s11 = sld [smem:[#allocation44_spill]]  ;;  %s2389_s1 = scalar_lea.sflag [#allocation10], %s3873_s26 }
 0x5b6   : > { %s4273_s24 = sld [smem:[#allocation45_spill]]  ;;  %s3381_s4 = scalar_lea.vmem %s4096_s16, 512 }
 0x5b7   : > { %p3382_p5 = scmp.ne.s32.totalorder %s4096_s16, %s3381_s4  ;;  %s3562_s7 = smov [#allocation20]  }
 0x5b8   : > { %s3385_s25 = sshll.u32 %s3562_s7, 4  ;;  %s3386_s25 = int_to_ptr.vmem [resolvable:$false] %s3385_s25 }
 0x5b9   : > { %p3383_p0 = pnand %p3382_p5, %p3817_p13  ;;  %p3388_p1 = scmp.lt.s32.totalorder %s4096_s16, %s3386_s25 }
 0x5ba   : > { %p2401_p6 = scmp.eq.s32.totalorder %s4271_s8, 2 }
 0x5bb   : > { %p3384_p2 = pneg %p3383_p0 }
 0x5bc   : > { %s4293_s19 = smov (!%p2401_p6, %s3527_s19), 0 }
 0x5bd   : > { %s2793_s12 = sshll.u32 %s4293_s19, 9  ;;  %s3387_s19 = scalar_lea.vmem %s3386_s25, 1024 }
 0x5be   : > { %s4101_s3 = scalar_lea.hbm %s4272_s11, %s2793_s12  ;;  %s4106_s20 = scalar_lea.hbm %s4273_s24, %s2793_s12 }
 0x5bf   : > { %p3389_p3 = scmp.lt.s32.totalorder %s3387_s19, %s3381_s4 }
 0x5c1   : > { %p3390_p7 = por %p3389_p3, %p3388_p1 }
 0x5c3   : > { %p3391_p8 = pnand %p3390_p7, %p3384_p2 }
 0x5c5   : > { %3394 = shalt.err (!%p3391_p8)
}
 0x5c6   : > { %s3395_s8 = scalar_lea.hbm %s4101_s3, 512  ;;  %s3399_s9 = scalar_lea.hbm %s4272_s11, 1024 }
 0x5c7   : > { %p3396_p10 = scmp.ne.s32.totalorder %s4101_s3, %s3395_s8  ;;  %p3400_p12 = scmp.lt.s32.totalorder %s4101_s3, %s4272_s11 }
 0x5c8   : > { %p3401_p6 = scmp.lt.s32.totalorder %s3399_s9, %s3395_s8 }
 0x5c9   : > { %p3397_p9 = pnand %p3396_p10, %p3817_p13 }
 0x5ca   : > { %p3402_p5 = por %p3401_p6, %p3400_p12 }
 0x5cb   : > { %p3398_p11 = pneg %p3397_p9 }
 0x5cd   : > { %p3403_p0 = pnand %p3402_p5, %p3398_p11 }
 0x5cf   : > { %3406 = shalt.err (!%p3403_p0)
}
 0x5d0   : > { %s3563_s4 = smov 128   ;;  %s3564_s7 = smov 8  }
 0x5d1   : > { %2879 = dma.vmem_to_hbm [thread:$0]  (%p3817_p13), %s4096_s16, 512, %s4101_s3, %s2389_s1, %s3563_s4, %s3563_s4, %s3564_s7  }
 0x5d2   : > { %s2427_s25 = sshll.u32 %s3881_s13, 4  ;;  %s2394_s19 = scalar_lea.sflag [#allocation22], %s3873_s26  ;;  %s4135_s25 = int_to_ptr.vmem [resolvable:$true] %s2427_s25 }
 0x5d3   : > { %s3407_s8 = scalar_lea.vmem %s4135_s25, 512  ;;  %s3565_s12 = smov [#allocation21]  }
 0x5d4   : > { %p3408_p2 = scmp.ne.s32.totalorder %s4135_s25, %s3407_s8  ;;  %s3411_s5 = sshll.u32 %s3565_s12, 4  ;;  %s3412_s5 = int_to_ptr.vmem [resolvable:$false] %s3411_s5 }
 0x5d5   : > { %s3413_s9 = scalar_lea.vmem %s3412_s5, 1024  ;;  %p3414_p7 = scmp.lt.s32.totalorder %s4135_s25, %s3412_s5 }
 0x5d6   : > { %p3409_p1 = pnand %p3408_p2, %p3817_p13  ;;  %p3415_p8 = scmp.lt.s32.totalorder %s3413_s9, %s3407_s8 }
 0x5d8   : > { %p3410_p3 = pneg %p3409_p1  ;;  %p3416_p10 = por %p3415_p8, %p3414_p7 }
 0x5da   : > { %p3417_p9 = pnand %p3416_p10, %p3410_p3 }
 0x5dc   : > { %3420 = shalt.err (!%p3417_p9)
}
 0x5dd   : > { %s3421_s13 = scalar_lea.hbm %s4106_s20, 512  ;;  %s3425_s3 = scalar_lea.hbm %s4273_s24, 1024 }
 0x5de   : > { %p3422_p11 = scmp.ne.s32.totalorder %s4106_s20, %s3421_s13  ;;  %p3426_p5 = scmp.lt.s32.totalorder %s4106_s20, %s4273_s24 }
 0x5df   : > { %p3427_p0 = scmp.lt.s32.totalorder %s3425_s3, %s3421_s13 }
 0x5e0   : > { %p3423_p12 = pnand %p3422_p11, %p3817_p13 }
 0x5e1   : > { %p3428_p2 = por %p3427_p0, %p3426_p5 }
 0x5e2   : > { %p3424_p6 = pneg %p3423_p12 }
 0x5e4   : > { %p3429_p1 = pnand %p3428_p2, %p3424_p6 }
 0x5e6   : > { %3432 = shalt.err (!%p3429_p1)
}
 0x5e7   : > { %2880 = dma.vmem_to_hbm [thread:$0]  (%p3817_p13), %s4135_s25, 512, %s4106_s20, %s2394_s19, %s3563_s4, %s3563_s4, %s3564_s7  }
 0x5e8 PF: > { %p2926_p3 = scmp.ge.s32.totalorder %s3543_s23, 2  ;;  %s2442_s14 = sand.u32 1, %s3503_s29  }
 0x5e9   : > { %s2443_s8 = scalar_lea.sflag [#allocation10], %s2442_s14 }
 0x5ea   : > { %p2907_p7 = pnand %p2926_p3, %p3829_p4 }
 0x5ec   : > { %p2908_p8 = pneg %p2907_p7 }
 0x5ee   : > { %3494 = dma.done.wait (%p2908_p8), %s2443_s8, 512  }
 0x5ef   : > { %3496 = vsyncadd (%p2908_p8), %s2443_s8, 4294966784  ;;  %s2452_s12 = scalar_lea.sflag [#allocation22], %s2442_s14 }
 0x5f0   : > { %3498 = dma.done.wait (%p2908_p8), %s2452_s12, 512  }
 0x5f1   : > { %3500 = vsyncadd (%p2908_p8), %s2452_s12, 4294966784  ;;  %s37_s23 = sadd.s32 1, %s3543_s23   ;;  %s4274_s2 = sld [smem:[#allocation30_spill]] }
 0x5f2   : > { %p34_p10 = scmp.ge.s32.totalorder %s37_s23, 8   ;;  %s4275_s10 = sld [smem:[#allocation31_spill]] }
 0x5f3   : > { %s4276_s29 = smov %s3507_s30  ;;  %s4277_s30 = smov %s3511_s15 }
 0x5f4   : > { %s4278_s15 = smov %s3827_s6  ;;  %s4279_s16 = smov %s3519_s17 }
 0x5f5   : > { %s4280_s17 = smov %s3523_s18  ;;  %s4281_s18 = smov %s3815_s28 }
 0x5f6   : > { %s4282_s19 = smov %s3535_s21  ;;  %s4283_s20 = smov %s3539_s22 }
 0x5f7   : > { %s4284_s21 = smov %s4274_s2  ;;  %36 = sbr.rel (!%p34_p10) target bundleno = 29 (0x1d), region = 186 }
 0x5f8   : > { %s4285_s22 = smov %s4275_s10 }
 0x5fc   :  { %2457 = vsyncpa [#allocation9], 1 }
 0x5fd   :  { %2459 = vsyncpa [#allocation9 + $0x1], 1 }
 0x5fe   :  { %2460 = vsyncpa [#allocation12], 1 }
 0x5ff   :  { %2461 = vsyncpa [#allocation15], 1 }
 0x600   :  { %2462 = vsyncpa [#allocation18], 1 }
 0x601   :  { %2463 = vsyncpa [#allocation10], 1 }
 0x602   :  { %2465 = vsyncpa [#allocation10 + $0x1], 1 }
 0x603   :  { %2466 = vsyncpa [#allocation22], 1 }
 0x604   :  { %2468 = vsyncpa [#allocation22 + $0x1], 1 }

</bundles_post_ra>
